<compile_context>
chip_gen: v7x
topology: tpu7x:2x2x1
jax: 0.10.0
libtpu: 0.0.40
codegen_flags: <defaults>
</compile_context>

<pallas_src>
import functools
import math

import jax
import jax.numpy as jnp
from jax.experimental import pallas as pl
from jax.experimental.pallas import tpu as pltpu


# ----------------------------------------------------------------------------
# Phase 1: ActNorm batch statistics (tiled accumulation over the batch grid).
# ----------------------------------------------------------------------------
def actnorm_stats_kernel(x_ref, s1_ref, s2_ref):
    @pl.when(pl.program_id(0) == 0)
    def _():
        s1_ref[...] = jnp.zeros_like(s1_ref)
        s2_ref[...] = jnp.zeros_like(s2_ref)

    xb = x_ref[...]                                        # (T, C) fp32
    s1_ref[...] += jnp.sum(xb, axis=0, keepdims=True)      # per-channel sum
    s2_ref[...] += jnp.sum(xb * xb, axis=0, keepdims=True)  # per-channel sumsq


# ----------------------------------------------------------------------------
# Phase 2: ActNorm apply + AffineCoupling (Wavenet) + change_order.
# Grid over batch; one grid step = one batch element, (T, channels) blocks.
# ----------------------------------------------------------------------------
def flow_coupling_kernel(loc_ref, scale_ref, x_ref, ca_ref,
                         wf_ref, bf_ref,
                         fg_w_ref, fgc_b_ref, cond_w_ref,
                         rs_w_ref, rs_b_ref,
                         fin1_w_ref, fin1_b_ref,
                         fin2_w_ref, fin2_b_ref,
                         out_x_ref, nls_ref,
                         fp_ref, hp_ref,
                         *, causal, fpad, hpad):
    T, C = x_ref.shape                    # batch dim squeezed by BlockSpec(None,...)
    half = C // 2
    rc = bf_ref.shape[1]                  # residual channels
    gc = fg_w_ref.shape[3] // 2           # gate channels
    sc = rs_b_ref.shape[2] - rc           # skip channels
    L = fg_w_ref.shape[0]                 # number of layers (static)
    koff = 2 if causal else 1             # tap offset s = (k - koff) * dilation
    sqrt_half = math.sqrt(0.5)
    bf16 = jnp.bfloat16

    def zero_halo(ref, pad_lo):
        """Zero only the halo rows; the interior is (re)written every use."""
        width = ref.shape[1]
        ref[pl.ds(0, pad_lo), :] = jnp.zeros((pad_lo, width), jnp.float32)
        pad_hi = ref.shape[0] - pad_lo - T
        if pad_hi > 0:
            ref[pl.ds(pad_lo + T, pad_hi), :] = jnp.zeros((pad_hi, width),
                                                          jnp.float32)

    def dilated_taps(scratch_ref, pad_lo, center_val, d):
        """k=3 dilated-conv taps: centre tap from the live value (no VMEM
        round-trip); side taps from the zero-padded scratch."""
        taps = []
        for k in range(3):
            s = (k - koff) * d
            if s == 0:
                taps.append((k, center_val))
            else:
                taps.append((k, scratch_ref[pl.ds(pad_lo + s, T), :]))
        return taps

    # ------------------ ActNorm (precomputed batch statistics) --------------
    xb = scale_ref[...] * (x_ref[...] + loc_ref[...])      # (T, C) fp32
    in_a, in_b = xb[:, :half], xb[:, half:]
    c_a = ca_ref[...]                                      # (T, c_half) fp32

    zero_halo(fp_ref, fpad)
    zero_halo(hp_ref, hpad)

    # ------------- front conv (k=3, dil=1) + ReLU ----------------------------
    fp_ref[pl.ds(fpad, T), :] = in_a                       # aligned store
    h = bf_ref[...]                                        # (1, rc) -> broadcast
    for k, tap in dilated_taps(fp_ref, fpad, in_a, 1):
        h = h + jnp.dot(tap.astype(bf16), wf_ref[k],
                        preferred_element_type=jnp.float32)
    h = jnp.maximum(h, 0.0)                                # (T, rc) fp32

    # ------- hoisted 1x1 local conditioning (+ fused conv biases) ------------
    cond = jnp.dot(c_a.astype(bf16), cond_w_ref[...],
                   preferred_element_type=jnp.float32) + fgc_b_ref[...]  # (T, L*2gc)

    # ------------------------- gated WaveNet layers --------------------------
    skip = jnp.zeros((T, sc), jnp.float32)
    for l in range(L):                      # static unroll (L is trace-time const)
        d = 1 << l                          # dilation 2**l
        hp_ref[pl.ds(hpad, T), :] = h       # aligned store (hpad % 8 == 0)
        u = cond[:, l * 2 * gc:(l + 1) * 2 * gc]
        for k, tap in dilated_taps(hp_ref, hpad, h, d):
            u = u + jnp.dot(tap.astype(bf16), fg_w_ref[l, k],
                            preferred_element_type=jnp.float32)
        z = jnp.tanh(u[:, :gc]) * jax.nn.sigmoid(u[:, gc:])   # fp32 gating
        rs = jnp.dot(z.astype(bf16), rs_w_ref[l],
                     preferred_element_type=jnp.float32) + rs_b_ref[l]
        h = (h + rs[:, :rc]) * sqrt_half
        skip = skip + rs[:, rc:]

    # ------------------- output 1x1 convs + affine coupling ------------------
    o = jnp.maximum(skip, 0.0)
    o = jnp.maximum(jnp.dot(o.astype(bf16), fin1_w_ref[...],
                            preferred_element_type=jnp.float32) + fin1_b_ref[...],
                    0.0)
    o = jnp.dot(o.astype(bf16), fin2_w_ref[...],
                preferred_element_type=jnp.float32) + fin2_b_ref[...]    # (T, C)

    log_s, t_sh = o[:, :half], o[:, half:]
    out_b = (in_b - t_sh) * jnp.exp(-log_s)                # fp32 epilogue

    # coupling output is cat([in_a, out_b]); change_order swaps the halves.
    # Direct slice stores: no concat temporary.
    out_x_ref[:, pl.ds(0, half)] = out_b
    out_x_ref[:, pl.ds(half, half)] = in_a
    nls_ref[...] = jnp.sum(-log_s, keepdims=True)          # per-batch partial


# ----------------------------------------------------------------------------
# Weight fusion (done once in the wrapper): filter||gate stacked along N,
# res||skip stacked along N, conditioning weights of all layers stacked so
# they can be applied in ONE matmul before the layer loop; biases folded.
# ----------------------------------------------------------------------------
def _fuse_params(p):
    L, _, rc, gc = p["filt_w"].shape
    c_half = p["filtc_w"].shape[1]
    bf16 = jnp.bfloat16

    fg_w = jnp.concatenate([p["filt_w"], p["gate_w"]], axis=3).astype(bf16)
    # (L, 3, rc, 2gc): per-layer, per-tap filter||gate weight.

    cond_w = jnp.transpose(
        jnp.concatenate([p["filtc_w"], p["gatec_w"]], axis=2),
        (1, 0, 2)).reshape(c_half, L * 2 * gc).astype(bf16)
    # (c_half, L*2gc): all-layer 1x1 conditioning in one matmul.

    fgc_b = jnp.concatenate([p["filt_b"] + p["filtc_b"],
                             p["gate_b"] + p["gatec_b"]],
                            axis=2).reshape(1, L * 2 * gc)     # fused biases

    rs_w = jnp.concatenate([p["res_w"], p["skip_w"]], axis=2).astype(bf16)
    rs_b = jnp.concatenate([p["res_b"], p["skip_b"]], axis=2)

    return (p["wf"].astype(bf16), p["bf"],
            fg_w, fgc_b, cond_w, rs_w, rs_b,
            p["fin1_w"].astype(bf16), p["fin1_b"],
            p["fin2_w"].astype(bf16), p["fin2_b"])


def _vmem_limit_bytes():
    """v7x has 64 MiB VMEM per TensorCore (vs 128 MiB on v5e/v6e): leave DMA
    headroom there, allow bigger resident blocks elsewhere."""
    try:
        cap = int(pltpu.get_tpu_info().vmem_capacity_bytes)
    except Exception:
        cap = 64 * 1024 * 1024
    return 40 * 1024 * 1024 if cap <= 64 * 1024 * 1024 else 64 * 1024 * 1024


# ----------------------------------------------------------------------------
# Wrapper
# ----------------------------------------------------------------------------
@functools.partial(jax.jit, static_argnames=("causal",))
def flow_forward(x_nct, c_nct, params, *, causal=False):
    B, C, T = x_nct.shape
    Cc = c_nct.shape[1]
    half, c_half = C // 2, Cc // 2
    x = jnp.transpose(x_nct, (0, 2, 1)).astype(jnp.float32)          # (B, T, C)
    # Only the used half of the conditioning enters the kernel.
    c_a = jnp.transpose(c_nct[:, :c_half, :], (0, 2, 1)).astype(jnp.float32)

    # --- Phase 1: ActNorm batch statistics (tiled accumulation over B) ------
    s1, s2 = pl.pallas_call(
        actnorm_stats_kernel,
        grid=(B,),
        out_shape=(jax.ShapeDtypeStruct((1, C), jnp.float32),
                   jax.ShapeDtypeStruct((1, C), jnp.float32)),
        in_specs=[pl.BlockSpec((None, T, C), lambda b: (b, 0, 0))],
        out_specs=(pl.BlockSpec((1, C), lambda b: (0, 0)),
                   pl.BlockSpec((1, C), lambda b: (0, 0))),
        compiler_params=pltpu.CompilerParams(
            dimension_semantics=("arbitrary",)),
    )(x)
    n = B * T
    mean = s1 / n
    var = jnp.maximum((s2 - s1 * s1 / n) / (n - 1), 0.0)   # torch.std: unbiased
    scale = 1.0 / (jnp.sqrt(var) + 1e-6)
    loc = -mean
    ld_an = jnp.mean(jnp.log(jnp.abs(scale)))

    # --- Phase 2: coupling kernel, grid over batch ---------------------------
    fused = _fuse_params(params)
    L = params["filt_w"].shape[0]
    rc = params["filt_w"].shape[2]
    maxd = 1 << (L - 1)
    pad_raw = 2 * maxd if causal else maxd
    hpad = ((pad_raw + 7) // 8) * 8            # aligned interior-store offset
    hp_rows = hpad + T + (0 if causal else maxd)
    fpad = 8
    fp_rows = fpad + T + (0 if causal else 1)

    def bcast(shape):                 # weight blocks: constant index map
        zeros = (0,) * len(shape)
        return pl.BlockSpec(shape, lambda b, z=zeros: z)

    in_specs = [bcast((1, C)), bcast((1, C)),
                pl.BlockSpec((None, T, C), lambda b: (b, 0, 0)),
                pl.BlockSpec((None, T, c_half), lambda b: (b, 0, 0))]
    in_specs += [bcast(a.shape) for a in fused]

    # NOTE: with B grid steps on one TC (split across TCs on v7x via
    # "parallel"), pipelining only kicks in for B >= ~3 per core; callers
    # should batch more flows per call for full DMA/compute overlap.
    out_x_ntc, nls = pl.pallas_call(
        functools.partial(flow_coupling_kernel, causal=causal,
                          fpad=fpad, hpad=hpad),
        grid=(B,),
        out_shape=(jax.ShapeDtypeStruct((B, T, C), jnp.float32),
                   jax.ShapeDtypeStruct((B, 1, 1), jnp.float32)),
        in_specs=in_specs,
        out_specs=(pl.BlockSpec((None, T, C), lambda b: (b, 0, 0)),
                   pl.BlockSpec((None, 1, 1), lambda b: (b, 0, 0))),
        scratch_shapes=[pltpu.VMEM((fp_rows, half), jnp.float32),   # front pad
                        pltpu.VMEM((hp_rows, rc), jnp.float32)],    # dilated pad
        compiler_params=pltpu.CompilerParams(
            dimension_semantics=("parallel",),
            vmem_limit_bytes=_vmem_limit_bytes()),
    )(loc, scale, x, c_a, *fused)

    out_x = jnp.transpose(out_x_ntc, (0, 2, 1))
    # change_order on the conditioning: plain XLA slice/concat (c_b never
    # touches VMEM).
    out_c = jnp.concatenate([c_nct[:, c_half:, :], c_nct[:, :c_half, :]],
                            axis=1).astype(jnp.float32)
    logdet = ld_an + 0.5 * jnp.sum(nls) / (B * half * T)
    return out_x, out_c, logdet


# ----------------------------------------------------------------------------
# Deterministic synthetic parameters (shapes implied by Flow.__init__)
# ----------------------------------------------------------------------------
def init_params(key, in_channel, cin_channel, filter_size, num_layer):
    half = in_channel // 2
    c_half = cin_channel // 2
    rc = gc = sc = filter_size
    out_ch = in_channel                       # affine=True -> 2 * (in_channel//2)
    L = num_layer
    keys = iter(jax.random.split(key, 32))

    def w(shape, fan_in):
        return jax.random.normal(next(keys), shape, jnp.float32) * (0.5 / math.sqrt(fan_in))

    def b(shape):
        return jax.random.normal(next(keys), shape, jnp.float32) * 0.01

    return {
        "wf": w((3, half, rc), 3 * half),              "bf": b((1, rc)),
        "filt_w": w((L, 3, rc, gc), 3 * rc),           "filt_b": b((L, 1, gc)),
        "gate_w": w((L, 3, rc, gc), 3 * rc),           "gate_b": b((L, 1, gc)),
        "filtc_w": w((L, c_half, gc), c_half),         "filtc_b": b((L, 1, gc)),
        "gatec_w": w((L, c_half, gc), c_half),         "gatec_b": b((L, 1, gc)),
        "res_w": w((L, gc, rc), gc),                   "res_b": b((L, 1, rc)),
        "skip_w": w((L, gc, sc), gc),                  "skip_b": b((L, 1, sc)),
        "fin1_w": w((sc, sc), sc),                     "fin1_b": b((1, sc)),
        "fin2_w": w((sc, out_ch), sc),                 "fin2_b": b((1, out_ch)),
    }


# ----------------------------------------------------------------------------
# Pure-JAX reference (fp32, channels-last), used to sanity-check the kernel.
# ----------------------------------------------------------------------------
def flow_reference(x, c, p, *, causal=False):
    B, T, C = x.shape
    Cc = c.shape[2]
    half, c_half = C // 2, Cc // 2
    L = p["filt_w"].shape[0]
    ein = functools.partial(jnp.einsum, precision="highest")

    n = B * T
    mean = jnp.mean(x, axis=(0, 1), keepdims=True)
    var = jnp.sum((x - mean) ** 2, axis=(0, 1), keepdims=True) / (n - 1)
    scale = 1.0 / (jnp.sqrt(var) + 1e-6)
    out = scale * (x - mean)
    logdet = jnp.mean(jnp.log(jnp.abs(scale)))

    def shift(u, s):
        if s == 0:
            return u
        pad = jnp.zeros((B, abs(s), u.shape[2]), u.dtype)
        if s > 0:
            return jnp.concatenate([u[:, s:, :], pad], axis=1)
        return jnp.concatenate([pad, u[:, :T + s, :]], axis=1)

    def conv3(u, w3, bias, d):
        acc = 0.0
        for k in range(3):
            s = ((k - 2) if causal else (k - 1)) * d
            acc = acc + ein("bti,io->bto", shift(u, s), w3[k])
        return acc + bias

    in_a, in_b = out[..., :half], out[..., half:]
    c_a, c_b = c[..., :c_half], c[..., c_half:]
    h = jax.nn.relu(conv3(in_a, p["wf"], p["bf"], 1))
    skip = 0.0
    for l in range(L):
        d = 2 ** l
        hf = conv3(h, p["filt_w"][l], p["filt_b"][l], d)
        hg = conv3(h, p["gate_w"][l], p["gate_b"][l], d)
        hf = hf + ein("bti,io->bto", c_a, p["filtc_w"][l]) + p["filtc_b"][l]
        hg = hg + ein("bti,io->bto", c_a, p["gatec_w"][l]) + p["gatec_b"][l]
        z = jnp.tanh(hf) * jax.nn.sigmoid(hg)
        h = (h + ein("bti,io->bto", z, p["res_w"][l]) + p["res_b"][l]) * math.sqrt(0.5)
        skip = skip + ein("bti,io->bto", z, p["skip_w"][l]) + p["skip_b"][l]
    o = jax.nn.relu(skip)
    o = jax.nn.relu(ein("bti,io->bto", o, p["fin1_w"]) + p["fin1_b"])
    o = ein("bti,io->bto", o, p["fin2_w"]) + p["fin2_b"]
    log_s, t = o[..., :half], o[..., half:]
    out_b = (in_b - t) * jnp.exp(-log_s)
    logdet = logdet + jnp.mean(-log_s) / 2
    return (jnp.concatenate([out_b, in_a], axis=-1),
            jnp.concatenate([c_b, c_a], axis=-1),
            logdet)


if __name__ == "__main__":
    B, in_channel, cin_channel, T = 2, 4, 8, 32
    filter_size, num_layer = 32, 4
    causal = False

    key = jax.random.PRNGKey(0)
    kx, kc, kp = jax.random.split(key, 3)
    x = jax.random.normal(kx, (B, in_channel, T), jnp.float32)   # NCT
    c = jax.random.normal(kc, (B, cin_channel, T), jnp.float32)  # NCT
    params = init_params(kp, in_channel, cin_channel, filter_size, num_layer)

    out_x, out_c, logdet = flow_forward(x, c, params, causal=causal)
    jax.block_until_ready((out_x, out_c, logdet))

    # sanity check against the fp32 pure-JAX reference (kernel matmuls are bf16)
    rx, rc_ref, rl = flow_reference(jnp.transpose(x, (0, 2, 1)),
                                    jnp.transpose(c, (0, 2, 1)),
                                    params, causal=causal)
    rx = jnp.transpose(rx, (0, 2, 1))
    rc_ref = jnp.transpose(rc_ref, (0, 2, 1))
    assert out_x.shape == (B, in_channel, T)
    assert out_c.shape == (B, cin_channel, T)
    assert jnp.allclose(out_x, rx, atol=5e-2, rtol=5e-2)      # bf16 matmul inputs
    assert jnp.allclose(out_c, rc_ref, atol=1e-5, rtol=1e-5)
    assert jnp.allclose(logdet, rl, atol=2e-2, rtol=2e-2)
    assert bool(jnp.isfinite(out_x).all()) and bool(jnp.isfinite(logdet))

    print("KERNEL_OK")
</pallas_src>

<mosaic_0001>
module attributes {stable_mosaic.version = 11 : i64} {
  func.func @actnorm_stats_kernel(%arg0: i32, %arg1: memref<1x32x4xf32, #tpu.memory_space<vmem>>, %arg2: memref<1x4xf32, #tpu.memory_space<vmem>>, %arg3: memref<1x4xf32, #tpu.memory_space<vmem>>) attributes {dimension_semantics = [#tpu.dimension_semantics<arbitrary>], iteration_bounds = array<i64: 2>, scalar_prefetch = 0 : i64, scratch_operands = 0 : i64, tpu.core_type = #tpu.core_type<tc>, window_params = [{transform_indices = @transform_0, window_bounds = array<i64: 1, 32, 4>}, {pipeline_mode = #tpu.pipeline_mode<synchronous>, transform_indices = @transform_1, window_bounds = array<i64: 1, 4>}, {pipeline_mode = #tpu.pipeline_mode<synchronous>, transform_indices = @transform_2, window_bounds = array<i64: 1, 4>}]} {
    %c0_i32 = arith.constant 0 : i32
    %0 = arith.cmpi eq, %arg0, %c0_i32 : i32
    %1 = arith.extui %0 : i1 to i32
    %c0_i32_0 = arith.constant 0 : i32
    %2 = arith.cmpi ne, %1, %c0_i32_0 : i32
    scf.if %2 {
      %cst_12 = arith.constant 0.000000e+00 : f32
      %16 = vector.broadcast %cst_12 : f32 to vector<1x4xf32>
      %c0_13 = arith.constant 0 : index
      %c0_14 = arith.constant 0 : index
      %17 = vector.load %arg2[%c0_13, %c0_14] : memref<1x4xf32, #tpu.memory_space<vmem>>, vector<1x4xf32>
      tpu.vector_store %arg2[%c0_13, %c0_14], %16 {strides = array<i32>} : memref<1x4xf32, #tpu.memory_space<vmem>>, vector<1x4xf32>,
      %cst_15 = arith.constant 0.000000e+00 : f32
      %18 = vector.broadcast %cst_15 : f32 to vector<1x4xf32>
      %c0_16 = arith.constant 0 : index
      %c0_17 = arith.constant 0 : index
      %19 = vector.load %arg3[%c0_16, %c0_17] : memref<1x4xf32, #tpu.memory_space<vmem>>, vector<1x4xf32>
      tpu.vector_store %arg3[%c0_16, %c0_17], %18 {strides = array<i32>} : memref<1x4xf32, #tpu.memory_space<vmem>>, vector<1x4xf32>,
    } else {
    }
    %c0 = arith.constant 0 : index
    %c0_1 = arith.constant 0 : index
    %c0_2 = arith.constant 0 : index
    %3 = vector.load %arg1[%c0, %c0_1, %c0_2] : memref<1x32x4xf32, #tpu.memory_space<vmem>>, vector<1x32x4xf32>
    %4 = vector.shape_cast %3 : vector<1x32x4xf32> to vector<32x4xf32>
    %c0_3 = arith.constant 0 : index
    %c0_4 = arith.constant 0 : index
    %5 = vector.load %arg2[%c0_3, %c0_4] : memref<1x4xf32, #tpu.memory_space<vmem>>, vector<1x4xf32>
    %cst = arith.constant dense<0.000000e+00> : vector<4xf32>
    %6 = vector.multi_reduction <add>, %4, %cst [0] : vector<32x4xf32> to vector<4xf32>
    %7 = vector.shape_cast %6 : vector<4xf32> to vector<1x4xf32>
    %8 = arith.addf %5, %7 : vector<1x4xf32>
    %c0_5 = arith.constant 0 : index
    %c0_6 = arith.constant 0 : index
    %9 = vector.load %arg2[%c0_5, %c0_6] : memref<1x4xf32, #tpu.memory_space<vmem>>, vector<1x4xf32>
    tpu.vector_store %arg2[%c0_5, %c0_6], %8 {strides = array<i32>} : memref<1x4xf32, #tpu.memory_space<vmem>>, vector<1x4xf32>,
    %c0_7 = arith.constant 0 : index
    %c0_8 = arith.constant 0 : index
    %10 = vector.load %arg3[%c0_7, %c0_8] : memref<1x4xf32, #tpu.memory_space<vmem>>, vector<1x4xf32>
    %11 = arith.mulf %4, %4 : vector<32x4xf32>
    %cst_9 = arith.constant dense<0.000000e+00> : vector<4xf32>
    %12 = vector.multi_reduction <add>, %11, %cst_9 [0] : vector<32x4xf32> to vector<4xf32>
    %13 = vector.shape_cast %12 : vector<4xf32> to vector<1x4xf32>
    %14 = arith.addf %10, %13 : vector<1x4xf32>
    %c0_10 = arith.constant 0 : index
    %c0_11 = arith.constant 0 : index
    %15 = vector.load %arg3[%c0_10, %c0_11] : memref<1x4xf32, #tpu.memory_space<vmem>>, vector<1x4xf32>
    tpu.vector_store %arg3[%c0_10, %c0_11], %14 {strides = array<i32>} : memref<1x4xf32, #tpu.memory_space<vmem>>, vector<1x4xf32>,
    return
  }
  func.func @transform_0(%arg0: i32) -> (i32, i32, i32) {
    %c0_i32 = arith.constant 0 : i32
    %c0_i32_0 = arith.constant 0 : i32
    %c0_i32_1 = arith.constant 0 : i32
    return %arg0, %c0_i32, %c0_i32_0 : i32, i32, i32
  }
  func.func @transform_1(%arg0: i32) -> (i32, i32) {
    %c0_i32 = arith.constant 0 : i32
    %c0_i32_0 = arith.constant 0 : i32
    %c0_i32_1 = arith.constant 0 : i32
    return %c0_i32, %c0_i32_0 : i32, i32
  }
  func.func @transform_2(%arg0: i32) -> (i32, i32) {
    %c0_i32 = arith.constant 0 : i32
    %c0_i32_0 = arith.constant 0 : i32
    %c0_i32_1 = arith.constant 0 : i32
    return %c0_i32, %c0_i32_0 : i32, i32
  }
}

module attributes {stable_mosaic.version = 11 : i64} {
  func.func @flow_coupling_kernel(%arg0: i32, %arg1: memref<1x4xf32, #tpu.memory_space<vmem>>, %arg2: memref<1x4xf32, #tpu.memory_space<vmem>>, %arg3: memref<1x32x4xf32, #tpu.memory_space<vmem>>, %arg4: memref<1x32x4xf32, #tpu.memory_space<vmem>>, %arg5: memref<3x2x32xbf16, #tpu.memory_space<vmem>>, %arg6: memref<1x32xf32, #tpu.memory_space<vmem>>, %arg7: memref<4x3x32x64xbf16, #tpu.memory_space<vmem>>, %arg8: memref<1x256xf32, #tpu.memory_space<vmem>>, %arg9: memref<4x256xbf16, #tpu.memory_space<vmem>>, %arg10: memref<4x32x64xbf16, #tpu.memory_space<vmem>>, %arg11: memref<4x1x64xf32, #tpu.memory_space<vmem>>, %arg12: memref<32x32xbf16, #tpu.memory_space<vmem>>, %arg13: memref<1x32xf32, #tpu.memory_space<vmem>>, %arg14: memref<32x4xbf16, #tpu.memory_space<vmem>>, %arg15: memref<1x4xf32, #tpu.memory_space<vmem>>, %arg16: memref<1x32x4xf32, #tpu.memory_space<vmem>>, %arg17: memref<1x1x1xf32, #tpu.memory_space<vmem>>, %arg18: memref<41x2xf32, #tpu.memory_space<vmem>>, %arg19: memref<48x32xf32, #tpu.memory_space<vmem>>) attributes {dimension_semantics = [#tpu.dimension_semantics<parallel>], iteration_bounds = array<i64: 2>, scalar_prefetch = 0 : i64, scratch_operands = 2 : i64, tpu.core_type = #tpu.core_type<tc>, window_params = [{pipeline_mode = #tpu.pipeline_mode<synchronous>, transform_indices = @transform_0, window_bounds = array<i64: 1, 4>}, {pipeline_mode = #tpu.pipeline_mode<synchronous>, transform_indices = @transform_1, window_bounds = array<i64: 1, 4>}, {transform_indices = @transform_2, window_bounds = array<i64: 1, 32, 4>}, {transform_indices = @transform_3, window_bounds = array<i64: 1, 32, 4>}, {pipeline_mode = #tpu.pipeline_mode<synchronous>, transform_indices = @transform_4, window_bounds = array<i64: 3, 2, 32>}, {pipeline_mode = #tpu.pipeline_mode<synchronous>, transform_indices = @transform_5, window_bounds = array<i64: 1, 32>}, {pipeline_mode = #tpu.pipeline_mode<synchronous>, transform_indices = @transform_6, window_bounds = array<i64: 4, 3, 32, 64>}, {pipeline_mode = #tpu.pipeline_mode<synchronous>, transform_indices = @transform_7, window_bounds = array<i64: 1, 256>}, {pipeline_mode = #tpu.pipeline_mode<synchronous>, transform_indices = @transform_8, window_bounds = array<i64: 4, 256>}, {pipeline_mode = #tpu.pipeline_mode<synchronous>, transform_indices = @transform_9, window_bounds = array<i64: 4, 32, 64>}, {pipeline_mode = #tpu.pipeline_mode<synchronous>, transform_indices = @transform_10, window_bounds = array<i64: 4, 1, 64>}, {pipeline_mode = #tpu.pipeline_mode<synchronous>, transform_indices = @transform_11, window_bounds = array<i64: 32, 32>}, {pipeline_mode = #tpu.pipeline_mode<synchronous>, transform_indices = @transform_12, window_bounds = array<i64: 1, 32>}, {pipeline_mode = #tpu.pipeline_mode<synchronous>, transform_indices = @transform_13, window_bounds = array<i64: 32, 4>}, {pipeline_mode = #tpu.pipeline_mode<synchronous>, transform_indices = @transform_14, window_bounds = array<i64: 1, 4>}, {transform_indices = @transform_15, window_bounds = array<i64: 1, 32, 4>}, {transform_indices = @transform_16, window_bounds = array<i64: 1, 1, 1>}]} {
    %c0 = arith.constant 0 : index
    %c0_0 = arith.constant 0 : index
    %0 = vector.load %arg2[%c0, %c0_0] : memref<1x4xf32, #tpu.memory_space<vmem>>, vector<1x4xf32>
    %c0_1 = arith.constant 0 : index
    %c0_2 = arith.constant 0 : index
    %c0_3 = arith.constant 0 : index
    %1 = vector.load %arg3[%c0_1, %c0_2, %c0_3] : memref<1x32x4xf32, #tpu.memory_space<vmem>>, vector<1x32x4xf32>
    %2 = vector.shape_cast %1 : vector<1x32x4xf32> to vector<32x4xf32>
    %c0_4 = arith.constant 0 : index
    %c0_5 = arith.constant 0 : index
    %3 = vector.load %arg1[%c0_4, %c0_5] : memref<1x4xf32, #tpu.memory_space<vmem>>, vector<1x4xf32>
    %4 = vector.broadcast %3 : vector<1x4xf32> to vector<32x4xf32>
    %5 = arith.addf %2, %4 : vector<32x4xf32>
    %6 = vector.broadcast %0 : vector<1x4xf32> to vector<32x4xf32>
    %7 = arith.mulf %6, %5 : vector<32x4xf32>
    %8 = vector.extract_strided_slice %7 {offsets = [0, 0], sizes = [32, 2], strides = [1, 1]} : vector<32x4xf32> to vector<32x2xf32>
    %9 = vector.extract_strided_slice %7 {offsets = [0, 2], sizes = [32, 2], strides = [1, 1]} : vector<32x4xf32> to vector<32x2xf32>
    %c0_6 = arith.constant 0 : index
    %c0_7 = arith.constant 0 : index
    %c0_8 = arith.constant 0 : index
    %10 = vector.load %arg4[%c0_6, %c0_7, %c0_8] : memref<1x32x4xf32, #tpu.memory_space<vmem>>, vector<1x32x4xf32>
    %11 = vector.shape_cast %10 : vector<1x32x4xf32> to vector<32x4xf32>
    %cst = arith.constant 0.000000e+00 : f32
    %12 = vector.broadcast %cst : f32 to vector<8x2xf32>
    %c0_9 = arith.constant 0 : index
    %c0_10 = arith.constant 0 : index
    %13 = vector.load %arg18[%c0_9, %c0_10] : memref<41x2xf32, #tpu.memory_space<vmem>>, vector<8x2xf32>
    tpu.vector_store %arg18[%c0_9, %c0_10], %12 {strides = array<i32>} : memref<41x2xf32, #tpu.memory_space<vmem>>, vector<8x2xf32>,
    %cst_11 = arith.constant 0.000000e+00 : f32
    %14 = vector.broadcast %cst_11 : f32 to vector<1x2xf32>
    %c40 = arith.constant 40 : index
    %c0_12 = arith.constant 0 : index
    %15 = vector.load %arg18[%c40, %c0_12] : memref<41x2xf32, #tpu.memory_space<vmem>>, vector<1x2xf32>
    tpu.vector_store %arg18[%c40, %c0_12], %14 {strides = array<i32>} : memref<41x2xf32, #tpu.memory_space<vmem>>, vector<1x2xf32>,
    %cst_13 = arith.constant 0.000000e+00 : f32
    %16 = vector.broadcast %cst_13 : f32 to vector<8x32xf32>
    %c0_14 = arith.constant 0 : index
    %c0_15 = arith.constant 0 : index
    %17 = vector.load %arg19[%c0_14, %c0_15] : memref<48x32xf32, #tpu.memory_space<vmem>>, vector<8x32xf32>
    tpu.vector_store %arg19[%c0_14, %c0_15], %16 {strides = array<i32>} : memref<48x32xf32, #tpu.memory_space<vmem>>, vector<8x32xf32>,
    %cst_16 = arith.constant 0.000000e+00 : f32
    %18 = vector.broadcast %cst_16 : f32 to vector<8x32xf32>
    %c40_17 = arith.constant 40 : index
    %c0_18 = arith.constant 0 : index
    %19 = vector.load %arg19[%c40_17, %c0_18] : memref<48x32xf32, #tpu.memory_space<vmem>>, vector<8x32xf32>
    tpu.vector_store %arg19[%c40_17, %c0_18], %18 {strides = array<i32>} : memref<48x32xf32, #tpu.memory_space<vmem>>, vector<8x32xf32>,
    %c8 = arith.constant 8 : index
    %c0_19 = arith.constant 0 : index
    %20 = vector.load %arg18[%c8, %c0_19] : memref<41x2xf32, #tpu.memory_space<vmem>>, vector<32x2xf32>
    tpu.vector_store %arg18[%c8, %c0_19], %8 {strides = array<i32>} : memref<41x2xf32, #tpu.memory_space<vmem>>, vector<32x2xf32>,
    %c0_20 = arith.constant 0 : index
    %c0_21 = arith.constant 0 : index
    %21 = vector.load %arg6[%c0_20, %c0_21] : memref<1x32xf32, #tpu.memory_space<vmem>>, vector<1x32xf32>
    %c7 = arith.constant 7 : index
    %c0_22 = arith.constant 0 : index
    %22 = vector.load %arg18[%c7, %c0_22] : memref<41x2xf32, #tpu.memory_space<vmem>>, vector<32x2xf32>
    %c9 = arith.constant 9 : index
    %c0_23 = arith.constant 0 : index
    %23 = vector.load %arg18[%c9, %c0_23] : memref<41x2xf32, #tpu.memory_space<vmem>>, vector<32x2xf32>
    %24 = arith.truncf %22 : vector<32x2xf32> to vector<32x2xbf16>
    %c0_24 = arith.constant 0 : index
    %c0_25 = arith.constant 0 : index
    %c0_26 = arith.constant 0 : index
    %25 = vector.load %arg5[%c0_24, %c0_25, %c0_26] : memref<3x2x32xbf16, #tpu.memory_space<vmem>>, vector<1x2x32xbf16>
    %26 = vector.shape_cast %25 : vector<1x2x32xbf16> to vector<2x32xbf16>
    %cst_27 = arith.constant dense<0.000000e+00> : vector<32x32xf32>
    %27 = tpu.matmul %24, %26, %cst_27 {dimension_numbers = #tpu.dot_dimension_numbers<[1], [0], [0], [1], [0, 0, 1, 1], [], []>} : vector<32x2xbf16>, vector<2x32xbf16>, vector<32x32xf32> -> vector<32x32xf32>
    %28 = vector.broadcast %21 : vector<1x32xf32> to vector<32x32xf32>
    %29 = arith.addf %28, %27 : vector<32x32xf32>
    %30 = arith.truncf %8 : vector<32x2xf32> to vector<32x2xbf16>
    %c1 = arith.constant 1 : index
    %c0_28 = arith.constant 0 : index
    %c0_29 = arith.constant 0 : index
    %31 = vector.load %arg5[%c1, %c0_28, %c0_29] : memref<3x2x32xbf16, #tpu.memory_space<vmem>>, vector<1x2x32xbf16>
    %32 = vector.shape_cast %31 : vector<1x2x32xbf16> to vector<2x32xbf16>
    %cst_30 = arith.constant dense<0.000000e+00> : vector<32x32xf32>
    %33 = tpu.matmul %30, %32, %cst_30 {dimension_numbers = #tpu.dot_dimension_numbers<[1], [0], [0], [1], [0, 0, 1, 1], [], []>} : vector<32x2xbf16>, vector<2x32xbf16>, vector<32x32xf32> -> vector<32x32xf32>
    %34 = arith.addf %29, %33 : vector<32x32xf32>
    %35 = arith.truncf %23 : vector<32x2xf32> to vector<32x2xbf16>
    %c2 = arith.constant 2 : index
    %c0_31 = arith.constant 0 : index
    %c0_32 = arith.constant 0 : index
    %36 = vector.load %arg5[%c2, %c0_31, %c0_32] : memref<3x2x32xbf16, #tpu.memory_space<vmem>>, vector<1x2x32xbf16>
    %37 = vector.shape_cast %36 : vector<1x2x32xbf16> to vector<2x32xbf16>
    %cst_33 = arith.constant dense<0.000000e+00> : vector<32x32xf32>
    %38 = tpu.matmul %35, %37, %cst_33 {dimension_numbers = #tpu.dot_dimension_numbers<[1], [0], [0], [1], [0, 0, 1, 1], [], []>} : vector<32x2xbf16>, vector<2x32xbf16>, vector<32x32xf32> -> vector<32x32xf32>
    %39 = arith.addf %34, %38 : vector<32x32xf32>
    %cst_34 = arith.constant 0.000000e+00 : f32
    %40 = vector.broadcast %cst_34 : f32 to vector<32x32xf32>
    %41 = arith.maximumf %39, %40 : vector<32x32xf32>
    %42 = arith.truncf %11 : vector<32x4xf32> to vector<32x4xbf16>
    %c0_35 = arith.constant 0 : index
    %c0_36 = arith.constant 0 : index
    %43 = vector.load %arg9[%c0_35, %c0_36] : memref<4x256xbf16, #tpu.memory_space<vmem>>, vector<4x256xbf16>
    %cst_37 = arith.constant dense<0.000000e+00> : vector<32x256xf32>
    %44 = tpu.matmul %42, %43, %cst_37 {dimension_numbers = #tpu.dot_dimension_numbers<[1], [0], [0], [1], [0, 0, 1, 1], [], []>} : vector<32x4xbf16>, vector<4x256xbf16>, vector<32x256xf32> -> vector<32x256xf32>
    %c0_38 = arith.constant 0 : index
    %c0_39 = arith.constant 0 : index
    %45 = vector.load %arg8[%c0_38, %c0_39] : memref<1x256xf32, #tpu.memory_space<vmem>>, vector<1x256xf32>
    %46 = vector.broadcast %45 : vector<1x256xf32> to vector<32x256xf32>
    %47 = arith.addf %44, %46 : vector<32x256xf32>
    %cst_40 = arith.constant 0.000000e+00 : f32
    %48 = vector.broadcast %cst_40 : f32 to vector<32x32xf32>
    %c8_41 = arith.constant 8 : index
    %c0_42 = arith.constant 0 : index
    %49 = vector.load %arg19[%c8_41, %c0_42] : memref<48x32xf32, #tpu.memory_space<vmem>>, vector<32x32xf32>
    tpu.vector_store %arg19[%c8_41, %c0_42], %41 {strides = array<i32>} : memref<48x32xf32, #tpu.memory_space<vmem>>, vector<32x32xf32>,
    %50 = vector.extract_strided_slice %47 {offsets = [0, 0], sizes = [32, 64], strides = [1, 1]} : vector<32x256xf32> to vector<32x64xf32>
    %c7_43 = arith.constant 7 : index
    %c0_44 = arith.constant 0 : index
    %51 = vector.load %arg19[%c7_43, %c0_44] : memref<48x32xf32, #tpu.memory_space<vmem>>, vector<32x32xf32>
    %c9_45 = arith.constant 9 : index
    %c0_46 = arith.constant 0 : index
    %52 = vector.load %arg19[%c9_45, %c0_46] : memref<48x32xf32, #tpu.memory_space<vmem>>, vector<32x32xf32>
    %53 = arith.truncf %51 : vector<32x32xf32> to vector<32x32xbf16>
    %c0_47 = arith.constant 0 : index
    %c0_48 = arith.constant 0 : index
    %c0_49 = arith.constant 0 : index
    %c0_50 = arith.constant 0 : index
    %54 = vector.load %arg7[%c0_47, %c0_48, %c0_49, %c0_50] : memref<4x3x32x64xbf16, #tpu.memory_space<vmem>>, vector<1x1x32x64xbf16>
    %55 = vector.shape_cast %54 : vector<1x1x32x64xbf16> to vector<32x64xbf16>
    %cst_51 = arith.constant dense<0.000000e+00> : vector<32x64xf32>
    %56 = tpu.matmul %53, %55, %cst_51 {dimension_numbers = #tpu.dot_dimension_numbers<[1], [0], [0], [1], [0, 0, 1, 1], [], []>} : vector<32x32xbf16>, vector<32x64xbf16>, vector<32x64xf32> -> vector<32x64xf32>
    %57 = arith.addf %50, %56 : vector<32x64xf32>
    %58 = arith.truncf %41 : vector<32x32xf32> to vector<32x32xbf16>
    %c0_52 = arith.constant 0 : index
    %c1_53 = arith.constant 1 : index
    %c0_54 = arith.constant 0 : index
    %c0_55 = arith.constant 0 : index
    %59 = vector.load %arg7[%c0_52, %c1_53, %c0_54, %c0_55] : memref<4x3x32x64xbf16, #tpu.memory_space<vmem>>, vector<1x1x32x64xbf16>
    %60 = vector.shape_cast %59 : vector<1x1x32x64xbf16> to vector<32x64xbf16>
    %cst_56 = arith.constant dense<0.000000e+00> : vector<32x64xf32>
    %61 = tpu.matmul %58, %60, %cst_56 {dimension_numbers = #tpu.dot_dimension_numbers<[1], [0], [0], [1], [0, 0, 1, 1], [], []>} : vector<32x32xbf16>, vector<32x64xbf16>, vector<32x64xf32> -> vector<32x64xf32>
    %62 = arith.addf %57, %61 : vector<32x64xf32>
    %63 = arith.truncf %52 : vector<32x32xf32> to vector<32x32xbf16>
    %c0_57 = arith.constant 0 : index
    %c2_58 = arith.constant 2 : index
    %c0_59 = arith.constant 0 : index
    %c0_60 = arith.constant 0 : index
    %64 = vector.load %arg7[%c0_57, %c2_58, %c0_59, %c0_60] : memref<4x3x32x64xbf16, #tpu.memory_space<vmem>>, vector<1x1x32x64xbf16>
    %65 = vector.shape_cast %64 : vector<1x1x32x64xbf16> to vector<32x64xbf16>
    %cst_61 = arith.constant dense<0.000000e+00> : vector<32x64xf32>
    %66 = tpu.matmul %63, %65, %cst_61 {dimension_numbers = #tpu.dot_dimension_numbers<[1], [0], [0], [1], [0, 0, 1, 1], [], []>} : vector<32x32xbf16>, vector<32x64xbf16>, vector<32x64xf32> -> vector<32x64xf32>
    %67 = arith.addf %62, %66 : vector<32x64xf32>
    %68 = vector.extract_strided_slice %67 {offsets = [0, 0], sizes = [32, 32], strides = [1, 1]} : vector<32x64xf32> to vector<32x32xf32>
    %69 = math.tanh %68 : vector<32x32xf32>
    %70 = vector.extract_strided_slice %67 {offsets = [0, 32], sizes = [32, 32], strides = [1, 1]} : vector<32x64xf32> to vector<32x32xf32>
    %71 = arith.negf %70 : vector<32x32xf32>
    %72 = math.exp %71 : vector<32x32xf32>
    %cst_62 = arith.constant 1.000000e+00 : f32
    %73 = vector.broadcast %cst_62 : f32 to vector<32x32xf32>
    %74 = arith.addf %73, %72 : vector<32x32xf32>
    %75 = arith.divf %73, %74 : vector<32x32xf32>
    %76 = arith.mulf %69, %75 : vector<32x32xf32>
    %77 = arith.truncf %76 : vector<32x32xf32> to vector<32x32xbf16>
    %c0_63 = arith.constant 0 : index
    %c0_64 = arith.constant 0 : index
    %c0_65 = arith.constant 0 : index
    %78 = vector.load %arg10[%c0_63, %c0_64, %c0_65] : memref<4x32x64xbf16, #tpu.memory_space<vmem>>, vector<1x32x64xbf16>
    %79 = vector.shape_cast %78 : vector<1x32x64xbf16> to vector<32x64xbf16>
    %cst_66 = arith.constant dense<0.000000e+00> : vector<32x64xf32>
    %80 = tpu.matmul %77, %79, %cst_66 {dimension_numbers = #tpu.dot_dimension_numbers<[1], [0], [0], [1], [0, 0, 1, 1], [], []>} : vector<32x32xbf16>, vector<32x64xbf16>, vector<32x64xf32> -> vector<32x64xf32>
    %c0_67 = arith.constant 0 : index
    %c0_68 = arith.constant 0 : index
    %c0_69 = arith.constant 0 : index
    %81 = vector.load %arg11[%c0_67, %c0_68, %c0_69] : memref<4x1x64xf32, #tpu.memory_space<vmem>>, vector<1x1x64xf32>
    %82 = vector.shape_cast %81 : vector<1x1x64xf32> to vector<1x64xf32>
    %83 = vector.broadcast %82 : vector<1x64xf32> to vector<32x64xf32>
    %84 = arith.addf %80, %83 : vector<32x64xf32>
    %85 = vector.extract_strided_slice %84 {offsets = [0, 0], sizes = [32, 32], strides = [1, 1]} : vector<32x64xf32> to vector<32x32xf32>
    %86 = arith.addf %41, %85 : vector<32x32xf32>
    %cst_70 = arith.constant 0.707106769 : f32
    %87 = vector.broadcast %cst_70 : f32 to vector<32x32xf32>
    %88 = arith.mulf %86, %87 : vector<32x32xf32>
    %89 = vector.extract_strided_slice %84 {offsets = [0, 32], sizes = [32, 32], strides = [1, 1]} : vector<32x64xf32> to vector<32x32xf32>
    %90 = arith.addf %48, %89 : vector<32x32xf32>
    %c8_71 = arith.constant 8 : index
    %c0_72 = arith.constant 0 : index
    %91 = vector.load %arg19[%c8_71, %c0_72] : memref<48x32xf32, #tpu.memory_space<vmem>>, vector<32x32xf32>
    tpu.vector_store %arg19[%c8_71, %c0_72], %88 {strides = array<i32>} : memref<48x32xf32, #tpu.memory_space<vmem>>, vector<32x32xf32>,
    %92 = vector.extract_strided_slice %47 {offsets = [0, 64], sizes = [32, 64], strides = [1, 1]} : vector<32x256xf32> to vector<32x64xf32>
    %c6 = arith.constant 6 : index
    %c0_73 = arith.constant 0 : index
    %93 = vector.load %arg19[%c6, %c0_73] : memref<48x32xf32, #tpu.memory_space<vmem>>, vector<32x32xf32>
    %c10 = arith.constant 10 : index
    %c0_74 = arith.constant 0 : index
    %94 = vector.load %arg19[%c10, %c0_74] : memref<48x32xf32, #tpu.memory_space<vmem>>, vector<32x32xf32>
    %95 = arith.truncf %93 : vector<32x32xf32> to vector<32x32xbf16>
    %c1_75 = arith.constant 1 : index
    %c0_76 = arith.constant 0 : index
    %c0_77 = arith.constant 0 : index
    %c0_78 = arith.constant 0 : index
    %96 = vector.load %arg7[%c1_75, %c0_76, %c0_77, %c0_78] : memref<4x3x32x64xbf16, #tpu.memory_space<vmem>>, vector<1x1x32x64xbf16>
    %97 = vector.shape_cast %96 : vector<1x1x32x64xbf16> to vector<32x64xbf16>
    %cst_79 = arith.constant dense<0.000000e+00> : vector<32x64xf32>
    %98 = tpu.matmul %95, %97, %cst_79 {dimension_numbers = #tpu.dot_dimension_numbers<[1], [0], [0], [1], [0, 0, 1, 1], [], []>} : vector<32x32xbf16>, vector<32x64xbf16>, vector<32x64xf32> -> vector<32x64xf32>
    %99 = arith.addf %92, %98 : vector<32x64xf32>
    %100 = arith.truncf %88 : vector<32x32xf32> to vector<32x32xbf16>
    %c1_80 = arith.constant 1 : index
    %c1_81 = arith.constant 1 : index
    %c0_82 = arith.constant 0 : index
    %c0_83 = arith.constant 0 : index
    %101 = vector.load %arg7[%c1_80, %c1_81, %c0_82, %c0_83] : memref<4x3x32x64xbf16, #tpu.memory_space<vmem>>, vector<1x1x32x64xbf16>
    %102 = vector.shape_cast %101 : vector<1x1x32x64xbf16> to vector<32x64xbf16>
    %cst_84 = arith.constant dense<0.000000e+00> : vector<32x64xf32>
    %103 = tpu.matmul %100, %102, %cst_84 {dimension_numbers = #tpu.dot_dimension_numbers<[1], [0], [0], [1], [0, 0, 1, 1], [], []>} : vector<32x32xbf16>, vector<32x64xbf16>, vector<32x64xf32> -> vector<32x64xf32>
    %104 = arith.addf %99, %103 : vector<32x64xf32>
    %105 = arith.truncf %94 : vector<32x32xf32> to vector<32x32xbf16>
    %c1_85 = arith.constant 1 : index
    %c2_86 = arith.constant 2 : index
    %c0_87 = arith.constant 0 : index
    %c0_88 = arith.constant 0 : index
    %106 = vector.load %arg7[%c1_85, %c2_86, %c0_87, %c0_88] : memref<4x3x32x64xbf16, #tpu.memory_space<vmem>>, vector<1x1x32x64xbf16>
    %107 = vector.shape_cast %106 : vector<1x1x32x64xbf16> to vector<32x64xbf16>
    %cst_89 = arith.constant dense<0.000000e+00> : vector<32x64xf32>
    %108 = tpu.matmul %105, %107, %cst_89 {dimension_numbers = #tpu.dot_dimension_numbers<[1], [0], [0], [1], [0, 0, 1, 1], [], []>} : vector<32x32xbf16>, vector<32x64xbf16>, vector<32x64xf32> -> vector<32x64xf32>
    %109 = arith.addf %104, %108 : vector<32x64xf32>
    %110 = vector.extract_strided_slice %109 {offsets = [0, 0], sizes = [32, 32], strides = [1, 1]} : vector<32x64xf32> to vector<32x32xf32>
    %111 = math.tanh %110 : vector<32x32xf32>
    %112 = vector.extract_strided_slice %109 {offsets = [0, 32], sizes = [32, 32], strides = [1, 1]} : vector<32x64xf32> to vector<32x32xf32>
    %113 = arith.negf %112 : vector<32x32xf32>
    %114 = math.exp %113 : vector<32x32xf32>
    %cst_90 = arith.constant 1.000000e+00 : f32
    %115 = vector.broadcast %cst_90 : f32 to vector<32x32xf32>
    %116 = arith.addf %115, %114 : vector<32x32xf32>
    %117 = arith.divf %115, %116 : vector<32x32xf32>
    %118 = arith.mulf %111, %117 : vector<32x32xf32>
    %119 = arith.truncf %118 : vector<32x32xf32> to vector<32x32xbf16>
    %c1_91 = arith.constant 1 : index
    %c0_92 = arith.constant 0 : index
    %c0_93 = arith.constant 0 : index
    %120 = vector.load %arg10[%c1_91, %c0_92, %c0_93] : memref<4x32x64xbf16, #tpu.memory_space<vmem>>, vector<1x32x64xbf16>
    %121 = vector.shape_cast %120 : vector<1x32x64xbf16> to vector<32x64xbf16>
    %cst_94 = arith.constant dense<0.000000e+00> : vector<32x64xf32>
    %122 = tpu.matmul %119, %121, %cst_94 {dimension_numbers = #tpu.dot_dimension_numbers<[1], [0], [0], [1], [0, 0, 1, 1], [], []>} : vector<32x32xbf16>, vector<32x64xbf16>, vector<32x64xf32> -> vector<32x64xf32>
    %c1_95 = arith.constant 1 : index
    %c0_96 = arith.constant 0 : index
    %c0_97 = arith.constant 0 : index
    %123 = vector.load %arg11[%c1_95, %c0_96, %c0_97] : memref<4x1x64xf32, #tpu.memory_space<vmem>>, vector<1x1x64xf32>
    %124 = vector.shape_cast %123 : vector<1x1x64xf32> to vector<1x64xf32>
    %125 = vector.broadcast %124 : vector<1x64xf32> to vector<32x64xf32>
    %126 = arith.addf %122, %125 : vector<32x64xf32>
    %127 = vector.extract_strided_slice %126 {offsets = [0, 0], sizes = [32, 32], strides = [1, 1]} : vector<32x64xf32> to vector<32x32xf32>
    %128 = arith.addf %88, %127 : vector<32x32xf32>
    %cst_98 = arith.constant 0.707106769 : f32
    %129 = vector.broadcast %cst_98 : f32 to vector<32x32xf32>
    %130 = arith.mulf %128, %129 : vector<32x32xf32>
    %131 = vector.extract_strided_slice %126 {offsets = [0, 32], sizes = [32, 32], strides = [1, 1]} : vector<32x64xf32> to vector<32x32xf32>
    %132 = arith.addf %90, %131 : vector<32x32xf32>
    %c8_99 = arith.constant 8 : index
    %c0_100 = arith.constant 0 : index
    %133 = vector.load %arg19[%c8_99, %c0_100] : memref<48x32xf32, #tpu.memory_space<vmem>>, vector<32x32xf32>
    tpu.vector_store %arg19[%c8_99, %c0_100], %130 {strides = array<i32>} : memref<48x32xf32, #tpu.memory_space<vmem>>, vector<32x32xf32>,
    %134 = vector.extract_strided_slice %47 {offsets = [0, 128], sizes = [32, 64], strides = [1, 1]} : vector<32x256xf32> to vector<32x64xf32>
    %c4 = arith.constant 4 : index
    %c0_101 = arith.constant 0 : index
    %135 = vector.load %arg19[%c4, %c0_101] : memref<48x32xf32, #tpu.memory_space<vmem>>, vector<32x32xf32>
    %c12 = arith.constant 12 : index
    %c0_102 = arith.constant 0 : index
    %136 = vector.load %arg19[%c12, %c0_102] : memref<48x32xf32, #tpu.memory_space<vmem>>, vector<32x32xf32>
    %137 = arith.truncf %135 : vector<32x32xf32> to vector<32x32xbf16>
    %c2_103 = arith.constant 2 : index
    %c0_104 = arith.constant 0 : index
    %c0_105 = arith.constant 0 : index
    %c0_106 = arith.constant 0 : index
    %138 = vector.load %arg7[%c2_103, %c0_104, %c0_105, %c0_106] : memref<4x3x32x64xbf16, #tpu.memory_space<vmem>>, vector<1x1x32x64xbf16>
    %139 = vector.shape_cast %138 : vector<1x1x32x64xbf16> to vector<32x64xbf16>
    %cst_107 = arith.constant dense<0.000000e+00> : vector<32x64xf32>
    %140 = tpu.matmul %137, %139, %cst_107 {dimension_numbers = #tpu.dot_dimension_numbers<[1], [0], [0], [1], [0, 0, 1, 1], [], []>} : vector<32x32xbf16>, vector<32x64xbf16>, vector<32x64xf32> -> vector<32x64xf32>
    %141 = arith.addf %134, %140 : vector<32x64xf32>
    %142 = arith.truncf %130 : vector<32x32xf32> to vector<32x32xbf16>
    %c2_108 = arith.constant 2 : index
    %c1_109 = arith.constant 1 : index
    %c0_110 = arith.constant 0 : index
    %c0_111 = arith.constant 0 : index
    %143 = vector.load %arg7[%c2_108, %c1_109, %c0_110, %c0_111] : memref<4x3x32x64xbf16, #tpu.memory_space<vmem>>, vector<1x1x32x64xbf16>
    %144 = vector.shape_cast %143 : vector<1x1x32x64xbf16> to vector<32x64xbf16>
    %cst_112 = arith.constant dense<0.000000e+00> : vector<32x64xf32>
    %145 = tpu.matmul %142, %144, %cst_112 {dimension_numbers = #tpu.dot_dimension_numbers<[1], [0], [0], [1], [0, 0, 1, 1], [], []>} : vector<32x32xbf16>, vector<32x64xbf16>, vector<32x64xf32> -> vector<32x64xf32>
    %146 = arith.addf %141, %145 : vector<32x64xf32>
    %147 = arith.truncf %136 : vector<32x32xf32> to vector<32x32xbf16>
    %c2_113 = arith.constant 2 : index
    %c2_114 = arith.constant 2 : index
    %c0_115 = arith.constant 0 : index
    %c0_116 = arith.constant 0 : index
    %148 = vector.load %arg7[%c2_113, %c2_114, %c0_115, %c0_116] : memref<4x3x32x64xbf16, #tpu.memory_space<vmem>>, vector<1x1x32x64xbf16>
    %149 = vector.shape_cast %148 : vector<1x1x32x64xbf16> to vector<32x64xbf16>
    %cst_117 = arith.constant dense<0.000000e+00> : vector<32x64xf32>
    %150 = tpu.matmul %147, %149, %cst_117 {dimension_numbers = #tpu.dot_dimension_numbers<[1], [0], [0], [1], [0, 0, 1, 1], [], []>} : vector<32x32xbf16>, vector<32x64xbf16>, vector<32x64xf32> -> vector<32x64xf32>
    %151 = arith.addf %146, %150 : vector<32x64xf32>
    %152 = vector.extract_strided_slice %151 {offsets = [0, 0], sizes = [32, 32], strides = [1, 1]} : vector<32x64xf32> to vector<32x32xf32>
    %153 = math.tanh %152 : vector<32x32xf32>
    %154 = vector.extract_strided_slice %151 {offsets = [0, 32], sizes = [32, 32], strides = [1, 1]} : vector<32x64xf32> to vector<32x32xf32>
    %155 = arith.negf %154 : vector<32x32xf32>
    %156 = math.exp %155 : vector<32x32xf32>
    %cst_118 = arith.constant 1.000000e+00 : f32
    %157 = vector.broadcast %cst_118 : f32 to vector<32x32xf32>
    %158 = arith.addf %157, %156 : vector<32x32xf32>
    %159 = arith.divf %157, %158 : vector<32x32xf32>
    %160 = arith.mulf %153, %159 : vector<32x32xf32>
    %161 = arith.truncf %160 : vector<32x32xf32> to vector<32x32xbf16>
    %c2_119 = arith.constant 2 : index
    %c0_120 = arith.constant 0 : index
    %c0_121 = arith.constant 0 : index
    %162 = vector.load %arg10[%c2_119, %c0_120, %c0_121] : memref<4x32x64xbf16, #tpu.memory_space<vmem>>, vector<1x32x64xbf16>
    %163 = vector.shape_cast %162 : vector<1x32x64xbf16> to vector<32x64xbf16>
    %cst_122 = arith.constant dense<0.000000e+00> : vector<32x64xf32>
    %164 = tpu.matmul %161, %163, %cst_122 {dimension_numbers = #tpu.dot_dimension_numbers<[1], [0], [0], [1], [0, 0, 1, 1], [], []>} : vector<32x32xbf16>, vector<32x64xbf16>, vector<32x64xf32> -> vector<32x64xf32>
    %c2_123 = arith.constant 2 : index
    %c0_124 = arith.constant 0 : index
    %c0_125 = arith.constant 0 : index
    %165 = vector.load %arg11[%c2_123, %c0_124, %c0_125] : memref<4x1x64xf32, #tpu.memory_space<vmem>>, vector<1x1x64xf32>
    %166 = vector.shape_cast %165 : vector<1x1x64xf32> to vector<1x64xf32>
    %167 = vector.broadcast %166 : vector<1x64xf32> to vector<32x64xf32>
    %168 = arith.addf %164, %167 : vector<32x64xf32>
    %169 = vector.extract_strided_slice %168 {offsets = [0, 0], sizes = [32, 32], strides = [1, 1]} : vector<32x64xf32> to vector<32x32xf32>
    %170 = arith.addf %130, %169 : vector<32x32xf32>
    %cst_126 = arith.constant 0.707106769 : f32
    %171 = vector.broadcast %cst_126 : f32 to vector<32x32xf32>
    %172 = arith.mulf %170, %171 : vector<32x32xf32>
    %173 = vector.extract_strided_slice %168 {offsets = [0, 32], sizes = [32, 32], strides = [1, 1]} : vector<32x64xf32> to vector<32x32xf32>
    %174 = arith.addf %132, %173 : vector<32x32xf32>
    %c8_127 = arith.constant 8 : index
    %c0_128 = arith.constant 0 : index
    %175 = vector.load %arg19[%c8_127, %c0_128] : memref<48x32xf32, #tpu.memory_space<vmem>>, vector<32x32xf32>
    tpu.vector_store %arg19[%c8_127, %c0_128], %172 {strides = array<i32>} : memref<48x32xf32, #tpu.memory_space<vmem>>, vector<32x32xf32>,
    %176 = vector.extract_strided_slice %47 {offsets = [0, 192], sizes = [32, 64], strides = [1, 1]} : vector<32x256xf32> to vector<32x64xf32>
    %c0_129 = arith.constant 0 : index
    %c0_130 = arith.constant 0 : index
    %177 = vector.load %arg19[%c0_129, %c0_130] : memref<48x32xf32, #tpu.memory_space<vmem>>, vector<32x32xf32>
    %c16 = arith.constant 16 : index
    %c0_131 = arith.constant 0 : index
    %178 = vector.load %arg19[%c16, %c0_131] : memref<48x32xf32, #tpu.memory_space<vmem>>, vector<32x32xf32>
    %179 = arith.truncf %177 : vector<32x32xf32> to vector<32x32xbf16>
    %c3 = arith.constant 3 : index
    %c0_132 = arith.constant 0 : index
    %c0_133 = arith.constant 0 : index
    %c0_134 = arith.constant 0 : index
    %180 = vector.load %arg7[%c3, %c0_132, %c0_133, %c0_134] : memref<4x3x32x64xbf16, #tpu.memory_space<vmem>>, vector<1x1x32x64xbf16>
    %181 = vector.shape_cast %180 : vector<1x1x32x64xbf16> to vector<32x64xbf16>
    %cst_135 = arith.constant dense<0.000000e+00> : vector<32x64xf32>
    %182 = tpu.matmul %179, %181, %cst_135 {dimension_numbers = #tpu.dot_dimension_numbers<[1], [0], [0], [1], [0, 0, 1, 1], [], []>} : vector<32x32xbf16>, vector<32x64xbf16>, vector<32x64xf32> -> vector<32x64xf32>
    %183 = arith.addf %176, %182 : vector<32x64xf32>
    %184 = arith.truncf %172 : vector<32x32xf32> to vector<32x32xbf16>
    %c3_136 = arith.constant 3 : index
    %c1_137 = arith.constant 1 : index
    %c0_138 = arith.constant 0 : index
    %c0_139 = arith.constant 0 : index
    %185 = vector.load %arg7[%c3_136, %c1_137, %c0_138, %c0_139] : memref<4x3x32x64xbf16, #tpu.memory_space<vmem>>, vector<1x1x32x64xbf16>
    %186 = vector.shape_cast %185 : vector<1x1x32x64xbf16> to vector<32x64xbf16>
    %cst_140 = arith.constant dense<0.000000e+00> : vector<32x64xf32>
    %187 = tpu.matmul %184, %186, %cst_140 {dimension_numbers = #tpu.dot_dimension_numbers<[1], [0], [0], [1], [0, 0, 1, 1], [], []>} : vector<32x32xbf16>, vector<32x64xbf16>, vector<32x64xf32> -> vector<32x64xf32>
    %188 = arith.addf %183, %187 : vector<32x64xf32>
    %189 = arith.truncf %178 : vector<32x32xf32> to vector<32x32xbf16>
    %c3_141 = arith.constant 3 : index
    %c2_142 = arith.constant 2 : index
    %c0_143 = arith.constant 0 : index
    %c0_144 = arith.constant 0 : index
    %190 = vector.load %arg7[%c3_141, %c2_142, %c0_143, %c0_144] : memref<4x3x32x64xbf16, #tpu.memory_space<vmem>>, vector<1x1x32x64xbf16>
    %191 = vector.shape_cast %190 : vector<1x1x32x64xbf16> to vector<32x64xbf16>
    %cst_145 = arith.constant dense<0.000000e+00> : vector<32x64xf32>
    %192 = tpu.matmul %189, %191, %cst_145 {dimension_numbers = #tpu.dot_dimension_numbers<[1], [0], [0], [1], [0, 0, 1, 1], [], []>} : vector<32x32xbf16>, vector<32x64xbf16>, vector<32x64xf32> -> vector<32x64xf32>
    %193 = arith.addf %188, %192 : vector<32x64xf32>
    %194 = vector.extract_strided_slice %193 {offsets = [0, 0], sizes = [32, 32], strides = [1, 1]} : vector<32x64xf32> to vector<32x32xf32>
    %195 = math.tanh %194 : vector<32x32xf32>
    %196 = vector.extract_strided_slice %193 {offsets = [0, 32], sizes = [32, 32], strides = [1, 1]} : vector<32x64xf32> to vector<32x32xf32>
    %197 = arith.negf %196 : vector<32x32xf32>
    %198 = math.exp %197 : vector<32x32xf32>
    %cst_146 = arith.constant 1.000000e+00 : f32
    %199 = vector.broadcast %cst_146 : f32 to vector<32x32xf32>
    %200 = arith.addf %199, %198 : vector<32x32xf32>
    %201 = arith.divf %199, %200 : vector<32x32xf32>
    %202 = arith.mulf %195, %201 : vector<32x32xf32>
    %203 = arith.truncf %202 : vector<32x32xf32> to vector<32x32xbf16>
    %c3_147 = arith.constant 3 : index
    %c0_148 = arith.constant 0 : index
    %c0_149 = arith.constant 0 : index
    %204 = vector.load %arg10[%c3_147, %c0_148, %c0_149] : memref<4x32x64xbf16, #tpu.memory_space<vmem>>, vector<1x32x64xbf16>
    %205 = vector.shape_cast %204 : vector<1x32x64xbf16> to vector<32x64xbf16>
    %cst_150 = arith.constant dense<0.000000e+00> : vector<32x64xf32>
    %206 = tpu.matmul %203, %205, %cst_150 {dimension_numbers = #tpu.dot_dimension_numbers<[1], [0], [0], [1], [0, 0, 1, 1], [], []>} : vector<32x32xbf16>, vector<32x64xbf16>, vector<32x64xf32> -> vector<32x64xf32>
    %c3_151 = arith.constant 3 : index
    %c0_152 = arith.constant 0 : index
    %c0_153 = arith.constant 0 : index
    %207 = vector.load %arg11[%c3_151, %c0_152, %c0_153] : memref<4x1x64xf32, #tpu.memory_space<vmem>>, vector<1x1x64xf32>
    %208 = vector.shape_cast %207 : vector<1x1x64xf32> to vector<1x64xf32>
    %209 = vector.broadcast %208 : vector<1x64xf32> to vector<32x64xf32>
    %210 = arith.addf %206, %209 : vector<32x64xf32>
    %211 = vector.extract_strided_slice %210 {offsets = [0, 32], sizes = [32, 32], strides = [1, 1]} : vector<32x64xf32> to vector<32x32xf32>
    %212 = arith.addf %174, %211 : vector<32x32xf32>
    %cst_154 = arith.constant 0.000000e+00 : f32
    %213 = vector.broadcast %cst_154 : f32 to vector<32x32xf32>
    %214 = arith.maximumf %212, %213 : vector<32x32xf32>
    %215 = arith.truncf %214 : vector<32x32xf32> to vector<32x32xbf16>
    %c0_155 = arith.constant 0 : index
    %c0_156 = arith.constant 0 : index
    %216 = vector.load %arg12[%c0_155, %c0_156] : memref<32x32xbf16, #tpu.memory_space<vmem>>, vector<32x32xbf16>
    %cst_157 = arith.constant dense<0.000000e+00> : vector<32x32xf32>
    %217 = tpu.matmul %215, %216, %cst_157 {dimension_numbers = #tpu.dot_dimension_numbers<[1], [0], [0], [1], [0, 0, 1, 1], [], []>} : vector<32x32xbf16>, vector<32x32xbf16>, vector<32x32xf32> -> vector<32x32xf32>
    %c0_158 = arith.constant 0 : index
    %c0_159 = arith.constant 0 : index
    %218 = vector.load %arg13[%c0_158, %c0_159] : memref<1x32xf32, #tpu.memory_space<vmem>>, vector<1x32xf32>
    %219 = vector.broadcast %218 : vector<1x32xf32> to vector<32x32xf32>
    %220 = arith.addf %217, %219 : vector<32x32xf32>
    %cst_160 = arith.constant 0.000000e+00 : f32
    %221 = vector.broadcast %cst_160 : f32 to vector<32x32xf32>
    %222 = arith.maximumf %220, %221 : vector<32x32xf32>
    %223 = arith.truncf %222 : vector<32x32xf32> to vector<32x32xbf16>
    %c0_161 = arith.constant 0 : index
    %c0_162 = arith.constant 0 : index
    %224 = vector.load %arg14[%c0_161, %c0_162] : memref<32x4xbf16, #tpu.memory_space<vmem>>, vector<32x4xbf16>
    %cst_163 = arith.constant dense<0.000000e+00> : vector<32x4xf32>
    %225 = tpu.matmul %223, %224, %cst_163 {dimension_numbers = #tpu.dot_dimension_numbers<[1], [0], [0], [1], [0, 0, 1, 1], [], []>} : vector<32x32xbf16>, vector<32x4xbf16>, vector<32x4xf32> -> vector<32x4xf32>
    %c0_164 = arith.constant 0 : index
    %c0_165 = arith.constant 0 : index
    %226 = vector.load %arg15[%c0_164, %c0_165] : memref<1x4xf32, #tpu.memory_space<vmem>>, vector<1x4xf32>
    %227 = vector.broadcast %226 : vector<1x4xf32> to vector<32x4xf32>
    %228 = arith.addf %225, %227 : vector<32x4xf32>
    %229 = vector.extract_strided_slice %228 {offsets = [0, 0], sizes = [32, 2], strides = [1, 1]} : vector<32x4xf32> to vector<32x2xf32>
    %230 = vector.extract_strided_slice %228 {offsets = [0, 2], sizes = [32, 2], strides = [1, 1]} : vector<32x4xf32> to vector<32x2xf32>
    %231 = arith.subf %9, %230 : vector<32x2xf32>
    %cst_166 = arith.constant 0.000000e+00 : f32
    %232 = vector.broadcast %cst_166 : f32 to vector<32x2xf32>
    %233 = arith.subf %232, %229 : vector<32x2xf32>
    %234 = math.exp %233 : vector<32x2xf32>
    %235 = arith.mulf %231, %234 : vector<32x2xf32>
    %c0_167 = arith.constant 0 : index
    %c0_168 = arith.constant 0 : index
    %c0_169 = arith.constant 0 : index
    %236 = vector.load %arg16[%c0_167, %c0_168, %c0_169] : memref<1x32x4xf32, #tpu.memory_space<vmem>>, vector<1x32x2xf32>
    %237 = vector.shape_cast %236 : vector<1x32x2xf32> to vector<32x2xf32>
    %238 = vector.shape_cast %235 : vector<32x2xf32> to vector<1x32x2xf32>
    tpu.vector_store %arg16[%c0_167, %c0_168, %c0_169], %238 {strides = array<i32>} : memref<1x32x4xf32, #tpu.memory_space<vmem>>, vector<1x32x2xf32>,
    %c0_170 = arith.constant 0 : index
    %c0_171 = arith.constant 0 : index
    %c2_172 = arith.constant 2 : index
    %239 = vector.load %arg16[%c0_170, %c0_171, %c2_172] : memref<1x32x4xf32, #tpu.memory_space<vmem>>, vector<1x32x2xf32>
    %240 = vector.shape_cast %239 : vector<1x32x2xf32> to vector<32x2xf32>
    %241 = vector.shape_cast %8 : vector<32x2xf32> to vector<1x32x2xf32>
    tpu.vector_store %arg16[%c0_170, %c0_171, %c2_172], %241 {strides = array<i32>} : memref<1x32x4xf32, #tpu.memory_space<vmem>>, vector<1x32x2xf32>,
    %cst_173 = arith.constant 0.000000e+00 : f32
    %242 = vector.broadcast %cst_173 : f32 to vector<32x2xf32>
    %243 = arith.subf %242, %229 : vector<32x2xf32>
    %244 = vector.shape_cast %243 : vector<32x2xf32> to vector<1x32x2xf32>
    %cst_174 = arith.constant dense<0.000000e+00> : vector<1xf32>
    %245 = vector.multi_reduction <add>, %244, %cst_174 [1, 2] : vector<1x32x2xf32> to vector<1xf32>
    %246 = vector.shape_cast %245 : vector<1xf32> to vector<1x1x1xf32>
    %247 = vector.extract %246[0, 0, 0] : f32 from vector<1x1x1xf32>
    %248 = vector.broadcast %247 : f32 to vector<1x1xf32>
    %c0_175 = arith.constant 0 : index
    %c0_176 = arith.constant 0 : index
    %c0_177 = arith.constant 0 : index
    %249 = vector.load %arg17[%c0_175, %c0_176, %c0_177] : memref<1x1x1xf32, #tpu.memory_space<vmem>>, vector<1x1x1xf32>
    %250 = vector.shape_cast %249 : vector<1x1x1xf32> to vector<1x1xf32>
    %251 = vector.shape_cast %248 : vector<1x1xf32> to vector<1x1x1xf32>
    tpu.vector_store %arg17[%c0_175, %c0_176, %c0_177], %251 {strides = array<i32>} : memref<1x1x1xf32, #tpu.memory_space<vmem>>, vector<1x1x1xf32>,
    return
  }
  func.func @transform_0(%arg0: i32) -> (i32, i32) {
    %c0_i32 = arith.constant 0 : i32
    %c0_i32_0 = arith.constant 0 : i32
    %c0_i32_1 = arith.constant 0 : i32
    return %c0_i32, %c0_i32_0 : i32, i32
  }
  func.func @transform_1(%arg0: i32) -> (i32, i32) {
    %c0_i32 = arith.constant 0 : i32
    %c0_i32_0 = arith.constant 0 : i32
    %c0_i32_1 = arith.constant 0 : i32
    return %c0_i32, %c0_i32_0 : i32, i32
  }
  func.func @transform_2(%arg0: i32) -> (i32, i32, i32) {
    %c0_i32 = arith.constant 0 : i32
    %c0_i32_0 = arith.constant 0 : i32
    %c0_i32_1 = arith.constant 0 : i32
    return %arg0, %c0_i32, %c0_i32_0 : i32, i32, i32
  }
  func.func @transform_3(%arg0: i32) -> (i32, i32, i32) {
    %c0_i32 = arith.constant 0 : i32
    %c0_i32_0 = arith.constant 0 : i32
    %c0_i32_1 = arith.constant 0 : i32
    return %arg0, %c0_i32, %c0_i32_0 : i32, i32, i32
  }
  func.func @transform_4(%arg0: i32) -> (i32, i32, i32) {
    %c0_i32 = arith.constant 0 : i32
    %c0_i32_0 = arith.constant 0 : i32
    %c0_i32_1 = arith.constant 0 : i32
    %c0_i32_2 = arith.constant 0 : i32
    return %c0_i32, %c0_i32_0, %c0_i32_1 : i32, i32, i32
  }
  func.func @transform_5(%arg0: i32) -> (i32, i32) {
    %c0_i32 = arith.constant 0 : i32
    %c0_i32_0 = arith.constant 0 : i32
    %c0_i32_1 = arith.constant 0 : i32
    return %c0_i32, %c0_i32_0 : i32, i32
  }
  func.func @transform_6(%arg0: i32) -> (i32, i32, i32, i32) {
    %c0_i32 = arith.constant 0 : i32
    %c0_i32_0 = arith.constant 0 : i32
    %c0_i32_1 = arith.constant 0 : i32
    %c0_i32_2 = arith.constant 0 : i32
    %c0_i32_3 = arith.constant 0 : i32
    return %c0_i32, %c0_i32_0, %c0_i32_1, %c0_i32_2 : i32, i32, i32, i32
  }
  func.func @transform_7(%arg0: i32) -> (i32, i32) {
    %c0_i32 = arith.constant 0 : i32
    %c0_i32_0 = arith.constant 0 : i32
    %c0_i32_1 = arith.constant 0 : i32
    return %c0_i32, %c0_i32_0 : i32, i32
  }
  func.func @transform_8(%arg0: i32) -> (i32, i32) {
    %c0_i32 = arith.constant 0 : i32
    %c0_i32_0 = arith.constant 0 : i32
    %c0_i32_1 = arith.constant 0 : i32
    return %c0_i32, %c0_i32_0 : i32, i32
  }
  func.func @transform_9(%arg0: i32) -> (i32, i32, i32) {
    %c0_i32 = arith.constant 0 : i32
    %c0_i32_0 = arith.constant 0 : i32
    %c0_i32_1 = arith.constant 0 : i32
    %c0_i32_2 = arith.constant 0 : i32
    return %c0_i32, %c0_i32_0, %c0_i32_1 : i32, i32, i32
  }
  func.func @transform_10(%arg0: i32) -> (i32, i32, i32) {
    %c0_i32 = arith.constant 0 : i32
    %c0_i32_0 = arith.constant 0 : i32
    %c0_i32_1 = arith.constant 0 : i32
    %c0_i32_2 = arith.constant 0 : i32
    return %c0_i32, %c0_i32_0, %c0_i32_1 : i32, i32, i32
  }
  func.func @transform_11(%arg0: i32) -> (i32, i32) {
    %c0_i32 = arith.constant 0 : i32
    %c0_i32_0 = arith.constant 0 : i32
    %c0_i32_1 = arith.constant 0 : i32
    return %c0_i32, %c0_i32_0 : i32, i32
  }
  func.func @transform_12(%arg0: i32) -> (i32, i32) {
    %c0_i32 = arith.constant 0 : i32
    %c0_i32_0 = arith.constant 0 : i32
    %c0_i32_1 = arith.constant 0 : i32
    return %c0_i32, %c0_i32_0 : i32, i32
  }
  func.func @transform_13(%arg0: i32) -> (i32, i32) {
    %c0_i32 = arith.constant 0 : i32
    %c0_i32_0 = arith.constant 0 : i32
    %c0_i32_1 = arith.constant 0 : i32
    return %c0_i32, %c0_i32_0 : i32, i32
  }
  func.func @transform_14(%arg0: i32) -> (i32, i32) {
    %c0_i32 = arith.constant 0 : i32
    %c0_i32_0 = arith.constant 0 : i32
    %c0_i32_1 = arith.constant 0 : i32
    return %c0_i32, %c0_i32_0 : i32, i32
  }
  func.func @transform_15(%arg0: i32) -> (i32, i32, i32) {
    %c0_i32 = arith.constant 0 : i32
    %c0_i32_0 = arith.constant 0 : i32
    %c0_i32_1 = arith.constant 0 : i32
    return %arg0, %c0_i32, %c0_i32_0 : i32, i32, i32
  }
  func.func @transform_16(%arg0: i32) -> (i32, i32, i32) {
    %c0_i32 = arith.constant 0 : i32
    %c0_i32_0 = arith.constant 0 : i32
    %c0_i32_1 = arith.constant 0 : i32
    return %arg0, %c0_i32, %c0_i32_0 : i32, i32, i32
  }
}

</mosaic_0001>

<bundles_post_ra>
// kernel: flow_forward.2
= control target key start
LH: loop header
LB: loop body
LE: loop exit
PB: predicated region body
PF: predicated region fallthrough
CT: control target
= control target key end

     0   :  { %s253_s9 = smov 0   ;;  %s293_s0 = inlined_call_operand.vmem [shape: f32[2,32,4], index: 0, kind: input, shape index: {}]   ;;  %s294_s1 = inlined_call_operand.vmem [shape: f32[1,4], index: 1, kind: output, shape index: {0}]   ;;  %s295_s2 = inlined_call_operand.vmem [shape: f32[1,4], index: 2, kind: output, shape index: {1}]  }
   0x1 LB: > { %s210_s10 = sadd.s32 4294967295, %s235_s9   ;;  %p213_p0 = scmp.ge.s32.totalorder %s235_s9, 1  ;;  %s235_s9 = sphi %s253_s9, %s13_s9  }
   0x2   : > { %p105_p1 = scmp.lt.s32.totalorder %s235_s9, 3 }
   0x4   : > { %p106_p2 = pnand %p213_p0, %p105_p1 }
   0x5   : > { %p122_p3 = scmp.lt.s32.totalorder (!%p106_p2), %s210_s10, 1  ;;  %p216_p4 = scmp.ne.s32.totalorder (!%p106_p2), %s210_s10, 0 }
   0x6   : > { %109 = sbr.rel (%p106_p2) target bundleno = 47 (0x2f), region = 24 }
   0xd   : > { %s123_s11 = scalar_select %p122_p3, %s210_s10, 1 }
   0xe   : > { %130 = sbr.rel (%p216_p4) target bundleno = 21 (0x15), region = 28  ;;  %vm131_vm0 = vcmask (!%p216_p4), 24576   ;;  %v237_v0 = vmov (!%p216_p4), 0.0  }
   0xf   : > { %s219_s12 = sshll.u32 %s123_s11, 5  ;;  %132 = vst.msk [vmem:[%s294_s1] sm:$0x1] (!%p216_p4), %vm131_vm0, %v237_v0  ;;  %133 = vst.msk [vmem:[%s295_s2] sm:$0x1] (!%p216_p4), %vm131_vm0, %v237_v0 }
  0x10   : > { %s126_s15 = scalar_lea.vmem %s293_s0, %s219_s12 }
  0x15 PF: > { %v134_v1 = vld [vmem:[%s126_s15] sm:$0xff]  ;;  %v135_v2 = vld [vmem:[%s126_s15 + $0x8] sm:$0xff]  ;;  %v136_v3 = vld [vmem:[%s126_s15 + $0x10] sm:$0xff]  ;;  %vm139_vm1 = vcmask 31744   ;;  %vm154_vm2 = vcmask 24576  }
  0x16   : > { %v137_v4 = vld [vmem:[%s126_s15 + $0x18] sm:$0xff]  ;;  %v140_v5 = vsel %vm139_vm1, %v134_v1, 0.0  ;;  %v141_v6 = vsel %vm139_vm1, %v135_v2, 0.0  ;;  %v143_v7 = vsel %vm139_vm1, %v136_v3, 0.0  ;;  %v157_v8 = vmul.f32 %v134_v1, %v134_v1  ;;  %v138_v31 = vld [vmem:[%s294_s1] sm:$0x1] }
  0x17   : > { %v142_v9 = vadd.f32 %v141_v6, %v140_v5  ;;  %v158_v10 = vmul.f32 %v135_v2, %v135_v2  ;;  %v159_v11 = vmul.f32 %v136_v3, %v136_v3  ;;  %v145_v12 = vsel %vm139_vm1, %v137_v4, 0.0  ;;  %v156_v36 = vld [vmem:[%s295_s2] sm:$0x1] }
  0x18   : > { %v160_v13 = vmul.f32 %v137_v4, %v137_v4  ;;  %v161_v14 = vsel %vm139_vm1, %v157_v8, 0.0 }
  0x19   : > { %v144_v15 = vadd.f32 %v143_v7, %v142_v9  ;;  %v162_v16 = vsel %vm139_vm1, %v158_v10, 0.0  ;;  %v164_v17 = vsel %vm139_vm1, %v159_v11, 0.0 }
  0x1a   : > { %v163_v18 = vadd.f32 %v162_v16, %v161_v14  ;;  %v166_v20 = vsel %vm139_vm1, %v160_v13, 0.0 }
  0x1b   : > { %v146_v19 = vadd.f32 %v145_v12, %v144_v15 }
  0x1c   : > { %v165_v21 = vadd.f32 %v164_v17, %v163_v18 }
  0x1d   : > { %v147_v22 = vrot.slane %v146_v19, 4 }
  0x1e   : > { %v167_v23 = vadd.f32 %v166_v20, %v165_v21 }
  0x1f   : > { %v148_v24 = vadd.f32 %v147_v22, %v146_v19 }
  0x20   : > { %v168_v25 = vrot.slane %v167_v23, 4 }
  0x21   : > { %v149_v26 = vrot.slane %v148_v24, 2 }
  0x22   : > { %v169_v27 = vadd.f32 %v168_v25, %v167_v23 }
  0x23   : > { %v150_v28 = vadd.f32 %v149_v26, %v148_v24 }
  0x24   : > { %v170_v29 = vrot.slane %v169_v27, 2 }
  0x25   : > { %v151_v30 = vrot.slane %v150_v28, 1 }
  0x26   : > { %v171_v32 = vadd.f32 %v170_v29, %v169_v27 }
  0x27   : > { %v152_v33 = vadd.f32 %v151_v30, %v150_v28 }
  0x28   : > { %v172_v34 = vrot.slane %v171_v32, 1 }
  0x29   : > { %v153_v35 = vadd.f32 %v152_v33, %v138_v31 }
  0x2a   : > { %v173_v37 = vadd.f32 %v172_v34, %v171_v32 }
  0x2b   : > { %155 = vst.msk [vmem:[%s294_s1] sm:$0x1] %vm154_vm2, %v153_v35 }
  0x2c   : > { %v174_v38 = vadd.f32 %v173_v37, %v156_v36 }
  0x2e   : > { %175 = vst.msk [vmem:[%s295_s2] sm:$0x1] %vm154_vm2, %v174_v38 }
  0x2f PF: > { %s13_s9 = sadd.s32 1, %s235_s9  }
  0x30   : > { %p10_p5 = scmp.ge.s32.totalorder %s13_s9, 4  }
  0x32   :  { %12 = sbr.rel (!%p10_p5) target bundleno = 1 (0x1), region = 62 }

// kernel: flow_forward.3
= control target key start
LH: loop header
LB: loop body
LE: loop exit
PB: predicated region body
PF: predicated region fallthrough
CT: control target
= control target key end

     0   :  { %s3624_s21 = smov 0   ;;  %s4099_s0 = inlined_call_operand.vmem [shape: f32[1,4], index: 0, kind: input, shape index: {}]   ;;  %s4100_s1 = inlined_call_operand.vmem [shape: f32[1,4], index: 1, kind: input, shape index: {}]   ;;  %s4101_s2 = inlined_call_operand.vmem [shape: f32[2,32,4], index: 2, kind: input, shape index: {}]   ;;  %s4102_s3 = inlined_call_operand.vmem [shape: f32[2,32,4], index: 3, kind: input, shape index: {}]   ;;  %s4103_s4 = inlined_call_operand.vmem [shape: bf16[3,2,32], index: 4, kind: input, shape index: {}]   ;;  %s4104_s5 = inlined_call_operand.vmem [shape: f32[1,32], index: 5, kind: input, shape index: {}]   ;;  %s4105_s6 = inlined_call_operand.vmem [shape: bf16[4,3,32,64], index: 6, kind: input, shape index: {}]   ;;  %s4106_s7 = inlined_call_operand.vmem [shape: f32[1,256], index: 7, kind: input, shape index: {}]   ;;  %s4107_s8 = inlined_call_operand.vmem [shape: bf16[4,256], index: 8, kind: input, shape index: {}]   ;;  %s4108_s9 = inlined_call_operand.vmem [shape: bf16[4,32,64], index: 9, kind: input, shape index: {}]   ;;  %s4109_s10 = inlined_call_operand.vmem [shape: f32[4,1,64], index: 10, kind: input, shape index: {}]   ;;  %s4110_s11 = inlined_call_operand.vmem [shape: bf16[32,32], index: 11, kind: input, shape index: {}]   ;;  %s4111_s12 = inlined_call_operand.vmem [shape: f32[1,32], index: 12, kind: input, shape index: {}]   ;;  %s4112_s13 = inlined_call_operand.vmem [shape: bf16[32,4], index: 13, kind: input, shape index: {}]   ;;  %s4113_s14 = inlined_call_operand.vmem [shape: f32[1,4], index: 14, kind: input, shape index: {}]   ;;  %s4114_s15 = inlined_call_operand.vmem [shape: f32[2,32,4], index: 15, kind: output, shape index: {0}]   ;;  %s4115_s16 = inlined_call_operand.vmem [shape: f32[2,1,1], index: 16, kind: output, shape index: {1}]  }
   0x1   :  { %4116 = sst [smem:[#allocation4_spill]] %s4099_s0 }
   0x2 LB: > { %s2903_s22 = sadd.s32 4294967295, %s3531_s21   ;;  %p2907_p0 = scmp.ge.s32.totalorder %s3531_s21, 1  ;;  %s3531_s21 = sphi %s3624_s21, %s27_s21  }
   0x3   : > { %p475_p1 = scmp.lt.s32.totalorder %s3531_s21, 3 }
   0x5   : > { %p476_p2 = pnand %p2907_p0, %p475_p1 }
   0x6   : > { %v604_v0 = vld [vmem:[%s4103_s4] sm:$0x1] (!%p476_p2)  ;;  %vm611_vm0 = vcmask (!%p476_p2), 1040384   ;;  %p533_p3 = scmp.lt.s32.totalorder (!%p476_p2), %s2903_s22, 1  ;;  %vm582_vm1 = vcmask (!%p476_p2), 15360   ;;  %vm584_vm2 = vcmask (!%p476_p2), 8192   ;;  %v815_v48 = vlaneseq (!%p476_p2) }
   0x7   : > { %479 = sbr.rel (%p476_p2) target bundleno = 4031 (0xfbf), region = 80  ;;  %3366 = vmatprep.subr.msk.bf16.mxu0 (!%p476_p2), %vm611_vm0, %v604_v0  ;;  %v613_v1 = vsel (!%p476_p2), %vm611_vm0, %v604_v0, 0  ;;  %v3533_v2 = vmov (!%p476_p2), 0.0   ;;  %vm586_vm3 = vcmask (!%p476_p2), 261120   ;;  %v2919_v3 = vld [vmem:[%s4103_s4 + $0x1] sm:$0x1] (!%p476_p2) }
   0x8   : > { %3169 = vmatpush3.bf16.msra.mxu0 (!%p476_p2), %v613_v1  ;;  %583 = vst.msk [vmem:[#allocation2] sm:$0xff] (!%p476_p2), %vm582_vm1, %v3533_v2  ;;  %v2925_v4 = vld.sshfl [vmem:[%s4107_s8] sm:$0x33 pattern:$0x76325410] (!%p476_p2)  ;;  %s4117_s19 = sld [smem:[#allocation4_spill]] (!%p476_p2) }
   0x9   : > { %585 = vst.msk [vmem:[#allocation2 + $0x28] sm:$0x1] (!%p476_p2), %vm584_vm2, %v3533_v2  ;;  %3367 = vmatprep.subr.msk.bf16.mxu0 (!%p476_p2), %vm611_vm0, %v2919_v3  ;;  %v2915_v5 = vld [vmem:[%s4100_s1] ss:$0 sm:$0xff] (!%p476_p2)  ;;  %v833_v7 = vcombine.high (!%p476_p2), %v2925_v4, %v2925_v4  ;;  %vm841_vm4 = vcmask (!%p476_p2), 1041408   ;;  %v3534_v9 = vmov (!%p476_p2), 0  }
   0xa   : > { %587 = vst.msk [vmem:[#allocation3] sm:$0xff] (!%p476_p2), %vm586_vm3, %v3533_v2  ;;  %588 = vst.msk [vmem:[#allocation3 + $0x28] sm:$0xff] (!%p476_p2), %vm586_vm3, %v3533_v2  ;;  %v843_v8 = vsel (!%p476_p2), %vm841_vm4, %v2925_v4, 0  ;;  %880 = vmatprep.mubr.bf16.mxu1 (!%p476_p2), %v3534_v9  ;;  %v2922_v22 = vld [vmem:[%s4103_s4 + $0x2] sm:$0x1] (!%p476_p2)  ;;  %v685_v30 = vsel (!%p476_p2), %vm611_vm0, %v2919_v3, 0 }
   0xb   : > { %2926 = vmatprep.subr.msk.bf16.mxu1 (!%p476_p2), %vm841_vm4, %v833_v7  ;;  %v751_v31 = vsel (!%p476_p2), %vm611_vm0, %v2922_v22, 0  ;;  %vm834_vm5 = vcmask (!%p476_p2), 31744   ;;  %v3385_v45 = vld [vmem:[%s4105_s6] sm:$0xff] (!%p476_p2)   ;;  %v3386_v46 = vld [vmem:[%s4105_s6 + $0x8] sm:$0xff] (!%p476_p2)   ;;  %v3387_v47 = vld [vmem:[%s4105_s6 + $0x10] sm:$0xff] (!%p476_p2)   ;;  %v3707_v49 = vshrl.u32 (!%p476_p2), %v815_v48, 7 }
   0xc   : > { %849 = vmatpush1.bf16.msra.mxu1 (!%p476_p2), %v843_v8  ;;  %v3712_v50 = vld [vmem:[%s4106_s7] sm:$0x3] (!%p476_p2)  ;;  %v3388_v8 = vld [vmem:[%s4105_s6 + $0x18] sm:$0xff] (!%p476_p2)   ;;  %s3535_s26 = smov (!%p476_p2), 96   ;;  %s3536_s0 = smov (!%p476_p2), 64   ;;  %vm2809_vm6 = vcmask (!%p476_p2), 0  }
   0xd   : > { %3186 = vmatprep.subr.bf16.mxu1 (!%p476_p2), %v3385_v45  ;;  %v821_v51 = vsub.s32 (!%p476_p2), 1, %v3707_v49  ;;  %v2918_v53 = vld [vmem:[%s4104_s5] ss:$0 sm:$0xff] (!%p476_p2)  ;;  %s3538_s20 = smov (!%p476_p2), 126   ;;  %vm2787_vm7 = vcmask (!%p476_p2), 31760  }
   0xe   : > { %s4119_s22 = smov (!%p533_p3, %s2903_s22), 1  ;;  %v2914_v6 = vld [vmem:[%s4117_s19] ss:$0 sm:$0xff]  ;;  %s3537_s19 = smov 2  }
   0xf   : > { %s3650_s29 = sshll.u32 %s4119_s22, 5  ;;  %v822_v52 = vrot.slane %v3712_v50, %v821_v51 }
  0x10   : > { %s537_s24 = scalar_lea.vmem %s4101_s2, %s3650_s29  ;;  %s542_s30 = scalar_lea.vmem %s4102_s3, %s3650_s29 }
  0x11   : > { %v553_v10 = vld [vmem:[%s537_s24] sm:$0xff]  ;;  %v554_v11 = vld [vmem:[%s537_s24 + $0x8] sm:$0xff]  ;;  %v555_v12 = vld [vmem:[%s537_s24 + $0x10] sm:$0xff] }
  0x12   : > { %v564_v13 = vadd.f32 %v2914_v6, %v553_v10  ;;  %v565_v14 = vadd.f32 %v2914_v6, %v554_v11  ;;  %v556_v15 = vld [vmem:[%s537_s24 + $0x18] sm:$0xff]  ;;  %v566_v16 = vadd.f32 %v2914_v6, %v555_v12  ;;  %v578_v39 = vld [vmem:[%s542_s30] sm:$0xff]  ;;  %v579_v40 = vld [vmem:[%s542_s30 + $0x8] sm:$0xff]  ;;  %s550_s24 = scalar_lea.vmem %s4115_s16, %s4119_s22 }
  0x13   : > { %v567_v17 = vadd.f32 %v2914_v6, %v556_v15  ;;  %v810_v41 = vpack.c.bf16 %v579_v40, %v578_v39  ;;  %v580_v42 = vld [vmem:[%s542_s30 + $0x10] sm:$0xff]  ;;  %v581_v43 = vld [vmem:[%s542_s30 + $0x18] sm:$0xff]  ;;  %v3389_v10 = vld [vmem:[%s4105_s6 + $0x20] sm:$0xff]   ;;  %s547_s30 = scalar_lea.vmem %s4114_s15, %s3650_s29 }
  0x14   : > { %v3662_v18 = vmul.f32 %v2915_v5, %v564_v13  ;;  %v3664_v19 = vmul.f32 %v2915_v5, %v565_v14  ;;  %v3666_v20 = vmul.f32 %v2915_v5, %v566_v16  ;;  %v811_v44 = vpack.c.bf16 %v581_v43, %v580_v42  ;;  %v3390_v14 = vld [vmem:[%s4105_s6 + $0x28] sm:$0xff]  }
  0x15   : > { %v3668_v21 = vmul.f32 %v2915_v5, %v567_v17  ;;  %2927 = vmatmul.mubr.msk.bf16.vlgmr.msra.gmra.mrb[0].mxu1 %vm834_vm5, %v810_v41 }
  0x16   : > { %589 = vst.msk [vmem:[#allocation2 + $0x8] sm:$0xff] %vm582_vm1, %v3662_v18  ;;  %590 = vst.msk [vmem:[#allocation2 + $0x10] sm:$0xff] %vm582_vm1, %v3664_v19  ;;  %v674_v28 = vpack.c.bf16 %v3664_v19, %v3662_v18  ;;  %890 = vmatprep.mubr.bf16.mxu1 %v3534_v9  ;;  %3187 = vmatpush3.bf16.msra.mxu1 %v3385_v45 }
  0x17   : > { %591 = vst.msk [vmem:[#allocation2 + $0x18] sm:$0xff] %vm582_vm1, %v3666_v20  ;;  %592 = vst.msk [vmem:[#allocation2 + $0x20] sm:$0xff] %vm582_vm1, %v3668_v21  ;;  %v675_v34 = vpack.c.bf16 %v3668_v21, %v3666_v20  ;;  %3188 = vmatprep.subr.bf16.mxu1 %v3386_v46 }
  0x1a   : > { %3189 = vmatpush3.bf16.msra.mxu1 %v3386_v46 }
  0x1b   : > { %3194 = vmatprep.subr.bf16.mxu1 %v3387_v47 }
  0x1d   : > { %v594_v23 = vld [vmem:[#allocation2 + $0x7] sm:$0xff]  ;;  %v595_v24 = vld [vmem:[#allocation2 + $0xf] sm:$0xff]  ;;  %2928 = vmatmul.mubr.msk.bf16.gmra.mrb[4].mxu1 %vm834_vm5, %v811_v44 }
  0x1e   : > { %v596_v25 = vld [vmem:[#allocation2 + $0x17] sm:$0xff]  ;;  %v602_v26 = vpack.c.bf16 %v595_v24, %v594_v23  ;;  %v597_v27 = vld [vmem:[#allocation2 + $0x1f] sm:$0xff]  ;;  %v598_v32 = vld [vmem:[#allocation2 + $0x9] sm:$0xff] }
  0x1f   : > { %v603_v29 = vpack.c.bf16 %v597_v27, %v596_v25  ;;  %v599_v33 = vld [vmem:[#allocation2 + $0x11] sm:$0xff]  ;;  %v600_v36 = vld [vmem:[#allocation2 + $0x19] sm:$0xff]  ;;  %v601_v37 = vld [vmem:[#allocation2 + $0x21] sm:$0xff] }
  0x20   : > { %3170 = vmatprep.mubr.msk.bf16.mxu0 %vm582_vm1, %v602_v26  ;;  %v740_v35 = vpack.c.bf16 %v599_v33, %v598_v32  ;;  %v741_v38 = vpack.c.bf16 %v601_v37, %v600_v36 }
  0x21   : > { %3171 = vmatmul.mubr.msk.bf16.vlgmr.msra.gmra.mrb[0].mxu0 %vm582_vm1, %v603_v29 }
  0x22   : > { %3175 = vmatpush3.bf16.msra.mxu0 %v685_v30  ;;  %3176 = vmatprep.mubr.msk.bf16.mxu0 %vm582_vm1, %v674_v28 }
  0x23   : > { %3368 = vmatprep.subr.msk.bf16.mxu0 %vm611_vm0, %v2922_v22 }
  0x2d   : > { %3177 = vmatmul.mubr.msk.bf16.vlgmr.msra.gmra.mrb[0].mxu0 %vm582_vm1, %v675_v34 }
  0x2e   : > { %3181 = vmatpush3.bf16.msra.mxu0 %v751_v31  ;;  %3182 = vmatprep.mubr.msk.bf16.mxu0 %vm582_vm1, %v740_v35  ;;  %v817_v35 = vsub.s32 0, %v3707_v49 }
  0x30   : > { %v818_v36 = vrot.slane %v3712_v50, %v817_v35 }
  0x39   : > { %3183 = vmatmul.mubr.msk.bf16.vlgmr.msra.gmra.mrb[0].mxu0 %vm582_vm1, %v741_v38 }
  0xe8   : > { %v882_v23 = vpop.f32.mrb[0].mxu1 }
  0xe9   : > { %v884_v24 = vpop.f32.mrb[1].mxu1  ;;  %v3766_v38 = vadd.f32 %v882_v23, %v818_v36 }
  0xea   : > { %v3754_v25 = vadd.f32 %v884_v24, %v822_v52  ;;  %v886_v26 = vpop.f32.mrb[2].mxu1 }
  0xeb   : > { %v888_v27 = vpop.f32.mrb[3].mxu1  ;;  %v3771_v43 = vadd.f32 %v886_v26, %v818_v36  ;;  %v3393_v26 = vld [vmem:[%s4105_s6 + $0x30] sm:$0xff]  }
  0xec   : > { %v3756_v28 = vadd.f32 %v888_v27, %v822_v52  ;;  %v3394_v27 = vld [vmem:[%s4105_s6 + $0x50] sm:$0xff]  }
  0xf0   : > { %v892_v29 = vpop.f32.mrb[4].mxu1 }
  0xf1   : > { %v894_v30 = vpop.f32.mrb[5].mxu1  ;;  %v3764_v37 = vadd.f32 %v892_v29, %v818_v36  ;;  %v3395_v29 = vld [vmem:[%s4105_s6 + $0x38] sm:$0xff]  }
  0xf2   : > { %v3758_v31 = vadd.f32 %v894_v30, %v822_v52  ;;  %v896_v32 = vpop.f32.mrb[6].mxu1  ;;  %v3396_v30 = vld [vmem:[%s4105_s6 + $0x58] sm:$0xff]  }
  0xf3   : > { %v898_v33 = vpop.f32.mrb[7].mxu1  ;;  %v3768_v40 = vadd.f32 %v896_v32, %v818_v36  ;;  %v3397_v32 = vld [vmem:[%s4105_s6 + $0x40] sm:$0xff]  }
  0xf4   : > { %v3760_v34 = vadd.f32 %v898_v33, %v822_v52  ;;  %v2953_v33 = vld [vmem:[%s4109_s10] ss:$0 sm:$0xff] }
 0x10c   : > { %v3184_v54 = vpop.f32.mrb[0].mxu0 }
 0x10d   : > { %v3330_v55 = vadd.f32 %v3184_v54, %v2918_v53  ;;  %v787_v56 = vpop.f32.mrb[1].mxu0 }
 0x10e   : > { %v3331_v57 = vadd.f32 %v2918_v53, %v787_v56  ;;  %v3185_v58 = vpop.f32.mrb[2].mxu0 }
 0x10f   : > { %v3719_v59 = vmax.f32 %v3330_v55, 0.0  ;;  %v3332_v60 = vadd.f32 %v3185_v58, %v2918_v53  ;;  %v790_v61 = vpop.f32.mrb[3].mxu0 }
 0x110   : > { %v3721_v62 = vmax.f32 %v3331_v57, 0.0  ;;  %v3333_v63 = vadd.f32 %v2918_v53, %v790_v61  ;;  %v3391_v57 = vld [vmem:[%s4108_s9] sm:$0xff]  }
 0x111   : > { %903 = vst.msk [vmem:[#allocation3 + $0x18] sm:$0xff] %vm586_vm3, %v3719_v59  ;;  %v3725_v0 = vmax.f32 %v3332_v60, 0.0  ;;  %3210 = vmatprep.subr.bf16.mxu0 %v3391_v57 }
 0x112   : > { %901 = vst.msk [vmem:[#allocation3 + $0x8] sm:$0xff] %vm586_vm3, %v3721_v62  ;;  %v3729_v1 = vmax.f32 %v3333_v63, 0.0  ;;  %3211 = vmatpush3.bf16.msra.mxu0 %v3391_v57 }
 0x113   : > { %904 = vst.msk [vmem:[#allocation3 + $0x20] sm:$0xff] %vm586_vm3, %v3725_v0  ;;  %v991_v13 = vpack.c.bf16 %v3725_v0, %v3719_v59 }
 0x114   : > { %902 = vst.msk [vmem:[#allocation3 + $0x10] sm:$0xff] %vm586_vm3, %v3729_v1  ;;  %v990_v9 = vpack.c.bf16 %v3729_v1, %v3721_v62 }
 0x119   : > { %v905_v3 = vld [vmem:[#allocation3 + $0x7] sm:$0xff] }
 0x11a   : > { %v908_v2 = vld [vmem:[#allocation3 + $0x1f] sm:$0xff] }
 0x11b   : > { %v906_v4 = vld [vmem:[#allocation3 + $0xf] sm:$0xff]  ;;  %v907_v5 = vld [vmem:[#allocation3 + $0x17] sm:$0xff]  ;;  %v912_v17 = vld [vmem:[#allocation3 + $0x21] sm:$0xff] }
 0x11c   : > { %v913_v6 = vpack.c.bf16 %v906_v4, %v905_v3  ;;  %v914_v7 = vpack.c.bf16 %v908_v2, %v907_v5  ;;  %v909_v11 = vld [vmem:[#allocation3 + $0x9] sm:$0xff]  ;;  %v910_v12 = vld [vmem:[#allocation3 + $0x11] sm:$0xff]  ;;  %v911_v16 = vld [vmem:[#allocation3 + $0x19] sm:$0xff] }
 0x11d   : > { %v1068_v15 = vpack.c.bf16 %v910_v12, %v909_v11  ;;  %v1069_v22 = vpack.c.bf16 %v912_v17, %v911_v16  ;;  %v3392_v2 = vld [vmem:[%s4108_s9 + $0x8] sm:$0xff]  }
 0x11e   : > { %3190 = vmatprep.mubr.msk.bf16.mxu1 %vm586_vm3, %v913_v6  ;;  %3212 = vmatprep.subr.bf16.mxu0 %v3392_v2 }
 0x11f   : > { %3191 = vmatmul.mubr.msk.bf16.vlgmr.msra.gmra.mrb[8].mxu1 %vm586_vm3, %v914_v7  ;;  %3213 = vmatpush3.bf16.msra.mxu0 %v3392_v2 }
 0x120   : > { %3195 = vmatpush3.bf16.msra.mxu1 %v3387_v47  ;;  %3198 = vmatprep.mubr.msk.bf16.mxu1 %vm586_vm3, %v990_v9 }
 0x121   : > { %3196 = vmatprep.subr.bf16.mxu1 %v3388_v8  ;;  %3218 = vmatprep.subr.bf16.mxu0 %v3393_v26 }
 0x124   : > { %3197 = vmatpush3.bf16.msra.mxu1 %v3388_v8 }
 0x125   : > { %3202 = vmatprep.subr.bf16.mxu1 %v3389_v10 }
 0x12b   : > { %3199 = vmatmul.mubr.msk.bf16.vlgmr.msra.gmra.mrb[8].mxu1 %vm586_vm3, %v991_v13 }
 0x12c   : > { %3203 = vmatpush3.bf16.msra.mxu1 %v3389_v10  ;;  %3206 = vmatprep.mubr.msk.bf16.mxu1 %vm586_vm3, %v1068_v15 }
 0x12d   : > { %3204 = vmatprep.subr.bf16.mxu1 %v3390_v14 }
 0x130   : > { %3205 = vmatpush3.bf16.msra.mxu1 %v3390_v14 }
 0x131   : > { %3234 = vmatprep.subr.bf16.mxu1 %v3394_v27 }
 0x137   : > { %3207 = vmatmul.mubr.msk.bf16.vlgmr.msra.gmra.mrb[8].mxu1 %vm586_vm3, %v1069_v22 }
 0x138   : > { %3235 = vmatpush3.bf16.msra.mxu1 %v3394_v27 }
 0x139   : > { %3236 = vmatprep.subr.bf16.mxu1 %v3396_v30 }
 0x13c   : > { %3237 = vmatpush3.bf16.msra.mxu1 %v3396_v30 }
 0x20a   : > { %v3208_v39 = vpop.f32.mrb[8].mxu1 }
 0x20b   : > { %v3334_v41 = vadd.f32 %v3208_v39, %v3764_v37  ;;  %v1127_v42 = vpop.f32.mrb[9].mxu1 }
 0x20c   : > { %v3335_v44 = vadd.f32 %v1127_v42, %v3766_v38  ;;  %v3209_v45 = vpop.f32.mrb[10].mxu1 }
 0x20d   : > { %v2951_v46 = vmul.f32 -1.442695, %v3334_v41  ;;  %v3336_v47 = vadd.f32 %v3209_v45, %v3768_v40  ;;  %v1130_v48 = vpop.f32.mrb[11].mxu1 }
 0x20e   : > { %v2949_v49 = vmul.f32 -1.442695, %v3335_v44  ;;  %v3337_v50 = vadd.f32 %v1130_v48, %v3771_v43 }
 0x20f   : > { %3421 = vpow2.f32 %v2951_v46  ;;  %v2952_v51 = vmul.f32 -1.442695, %v3336_v47 }
 0x210   : > { %3423 = vpow2.f32 %v2949_v49  ;;  %v2950_v52 = vmul.f32 -1.442695, %v3337_v50 }
 0x211   : > { %3425 = vpow2.f32 %v2952_v51 }
 0x212   : > { %3427 = vpow2.f32 %v2950_v52 }
 0x219   : > { %v3422_v53 = vpop.eup %3421 }
 0x21a   : > { %v3424_v54 = vpop.eup %3423  ;;  %v1164_v55 = vadd.f32 1.0, %v3422_v53 }
 0x21b   : > { %v1162_v56 = vadd.f32 1.0, %v3424_v54  ;;  %v3426_v58 = vpop.eup %3425 }
 0x21c   : > { %3429 = vrcp.f32 %v1164_v55  ;;  %v1165_v60 = vadd.f32 1.0, %v3426_v58  ;;  %v3428_v61 = vpop.eup %3427 }
 0x21d   : > { %3431 = vrcp.f32 %v1162_v56  ;;  %v1163_v63 = vadd.f32 1.0, %v3428_v61 }
 0x21e   : > { %3433 = vrcp.f32 %v1165_v60 }
 0x21f   : > { %3435 = vrcp.f32 %v1163_v63 }
 0x220   : > { %3437 = vtanh.f32 %v3334_v41 }
 0x221   : > { %3439 = vtanh.f32 %v3335_v44 }
 0x222   : > { %3441 = vtanh.f32 %v3336_v47 }
 0x223   : > { %3443 = vtanh.f32 %v3337_v50 }
 0x226   : > { %v3430_v3 = vpop.eup %3429 }
 0x227   : > { %v3432_v4 = vpop.eup %3431  ;;  %1182 = vrot.lane.b32.xlu1 %v3430_v3, %s3535_s26  ;;  %v3398_v3 = vld [vmem:[%s4105_s6 + $0x48] sm:$0xff]  }
 0x228   : > { %1178 = vrot.lane.b32.xlu0 %v3432_v4, %s3535_s26  ;;  %v3434_v5 = vpop.eup %3433 }
 0x229   : > { %v3436_v6 = vpop.eup %3435 }
 0x22a   : > { %v3438_v9 = vpop.eup %3437 }
 0x22b   : > { %1184 = vrot.lane.b32.xlu1 %v3434_v5, %s3535_s26  ;;  %v3440_v10 = vpop.eup %3439 }
 0x22c   : > { %1180 = vrot.lane.b32.xlu0 %v3436_v6, %s3535_s26  ;;  %v3442_v11 = vpop.eup %3441 }
 0x22d   : > { %v3444_v13 = vpop.eup %3443 }
 0x299   : > { %v1183_v7 = vpop.permute.xlu1 %1182 }
 0x29a   : > { %v1179_v8 = vpop.permute.xlu0 %1178  ;;  %v1192_v14 = vmul.f32 %v3438_v9, %v1183_v7 }
 0x29b   : > { %v1190_v17 = vmul.f32 %v3440_v10, %v1179_v8 }
 0x29d   : > { %v1185_v12 = vpop.permute.xlu1 %1184 }
 0x29e   : > { %v1193_v15 = vmul.f32 %v3442_v11, %v1185_v12  ;;  %v1181_v16 = vpop.permute.xlu0 %1180 }
 0x29f   : > { %v1191_v22 = vmul.f32 %v3444_v13, %v1181_v16 }
 0x2a0   : > { %v1195_v23 = vpack.c.bf16 %v1193_v15, %v1192_v14 }
 0x2a1   : > { %v1194_v24 = vpack.c.bf16 %v1191_v22, %v1190_v17 }
 0x2a3   : > { %3214 = vmatprep.mubr.msk.bf16.mxu0 %vm586_vm3, %v1194_v24 }
 0x2a4   : > { %3215 = vmatmul.mubr.msk.bf16.vlgmr.msra.gmra.mrb[4].mxu0 %vm586_vm3, %v1195_v23 }
 0x2a5   : > { %3219 = vmatpush3.bf16.msra.mxu0 %v3393_v26 }
 0x2a6   : > { %3220 = vmatprep.subr.bf16.mxu0 %v3395_v29 }
 0x2a9   : > { %3221 = vmatpush3.bf16.msra.mxu0 %v3395_v29 }
 0x2aa   : > { %3226 = vmatprep.subr.bf16.mxu0 %v3397_v32 }
 0x377   : > { %v3216_v35 = vpop.f32.mrb[4].mxu0 }
 0x378   : > { %v3806_v36 = vadd.f32 %v3216_v35, %v2953_v33  ;;  %v1259_v39 = vpop.f32.mrb[5].mxu0 }
 0x379   : > { %v3808_v41 = vadd.f32 %v2953_v33, %v1259_v39  ;;  %v3217_v42 = vpop.f32.mrb[6].mxu0 }
 0x37a   : > { %v1276_v44 = vadd.f32 %v3806_v36, %v3719_v59  ;;  %v3812_v45 = vadd.f32 %v3217_v42, %v2953_v33  ;;  %v1262_v46 = vpop.f32.mrb[7].mxu0 }
 0x37b   : > { %v1274_v47 = vadd.f32 %v3808_v41, %v3721_v62  ;;  %v3816_v48 = vadd.f32 %v2953_v33, %v1262_v46 }
 0x37c   : > { %v3818_v49 = vmul.f32 0.70710677, %v1276_v44  ;;  %v1277_v50 = vadd.f32 %v3812_v45, %v3725_v0 }
 0x37d   : > { %v3822_v51 = vmul.f32 0.70710677, %v1274_v47  ;;  %v1275_v52 = vadd.f32 %v3816_v48, %v3729_v1 }
 0x37e   : > { %1288 = vst.msk [vmem:[#allocation3 + $0x18] sm:$0xff] %vm586_vm3, %v3818_v49  ;;  %v3828_v59 = vmul.f32 0.70710677, %v1277_v50 }
 0x37f   : > { %1286 = vst.msk [vmem:[#allocation3 + $0x8] sm:$0xff] %vm586_vm3, %v3822_v51  ;;  %v3832_v62 = vmul.f32 0.70710677, %v1275_v52 }
 0x380   : > { %1289 = vst.msk [vmem:[#allocation3 + $0x20] sm:$0xff] %vm586_vm3, %v3828_v59  ;;  %v1393_v5 = vpack.c.bf16 %v3828_v59, %v3818_v49 }
 0x381   : > { %1287 = vst.msk [vmem:[#allocation3 + $0x10] sm:$0xff] %vm586_vm3, %v3832_v62  ;;  %v1392_v4 = vpack.c.bf16 %v3832_v62, %v3822_v51 }
 0x386   : > { %v1290_v0 = vld [vmem:[#allocation3 + $0x6] sm:$0xff] }
 0x387   : > { %v1293_v53 = vld [vmem:[#allocation3 + $0x1e] sm:$0xff] }
 0x388   : > { %v1296_v54 = vld [vmem:[#allocation3 + $0x1a] sm:$0xff]  ;;  %v1297_v1 = vld [vmem:[#allocation3 + $0x22] sm:$0xff]  ;;  %v1291_v55 = vld [vmem:[#allocation3 + $0xe] sm:$0xff] }
 0x389   : > { %v1294_v56 = vld [vmem:[#allocation3 + $0xa] sm:$0xff]  ;;  %v1295_v57 = vld [vmem:[#allocation3 + $0x12] sm:$0xff]  ;;  %v1298_v58 = vpack.c.bf16 %v1291_v55, %v1290_v0  ;;  %v1487_v2 = vpack.c.bf16 %v1297_v1, %v1296_v54 }
 0x38a   : > { %v1486_v60 = vpack.c.bf16 %v1295_v57, %v1294_v56  ;;  %v1292_v61 = vld [vmem:[#allocation3 + $0x16] sm:$0xff] }
 0x38b   : > { %v1299_v63 = vpack.c.bf16 %v1293_v53, %v1292_v61  ;;  %3222 = vmatprep.mubr.msk.bf16.mxu0 %vm586_vm3, %v1298_v58 }
 0x38c   : > { %3238 = vmatprep.mubr.msk.bf16.mxu1 %vm586_vm3, %v1486_v60 }
 0x38d   : > { %3223 = vmatmul.mubr.msk.bf16.vlgmr.msra.gmra.mrb[8].mxu0 %vm586_vm3, %v1299_v63  ;;  %3239 = vmatmul.mubr.msk.bf16.vlgmr.msra.gmra.mrb[12].mxu1 %vm586_vm3, %v1487_v2 }
 0x38e   : > { %3227 = vmatpush3.bf16.msra.mxu0 %v3397_v32  ;;  %3230 = vmatprep.mubr.msk.bf16.mxu0 %vm586_vm3, %v1392_v4 }
 0x38f   : > { %3228 = vmatprep.subr.bf16.mxu0 %v3398_v3 }
 0x392   : > { %3229 = vmatpush3.bf16.msra.mxu0 %v3398_v3 }
 0x395   : > { %3231 = vmatmul.mubr.msk.bf16.vlgmr.msra.gmra.mrb[12].mxu0 %vm586_vm3, %v1393_v5 }
 0x460   : > { %v3224_v6 = vpop.f32.mrb[8].mxu0  ;;  %v3240_v7 = vpop.f32.mrb[12].mxu1 }
 0x461   : > { %v1545_v8 = vpop.f32.mrb[13].mxu1  ;;  %1380 = vrot.lane.b32.xlu0 %v3224_v6, %s3536_s0  ;;  %v1357_v9 = vpop.f32.mrb[9].mxu0  ;;  %v3399_v6 = vld [vmem:[%s4108_s9 + $0x10] sm:$0xff]  }
 0x462   : > { %v3225_v10 = vpop.f32.mrb[10].mxu0  ;;  %v3241_v11 = vpop.f32.mrb[14].mxu1  ;;  %3242 = vmatprep.subr.bf16.mxu0 %v3399_v6 }
 0x463   : > { %v1548_v12 = vpop.f32.mrb[15].mxu1  ;;  %1382 = vrot.lane.b32.xlu1 %v3225_v10, %s3536_s0  ;;  %v1360_v13 = vpop.f32.mrb[11].mxu0  ;;  %3243 = vmatpush3.bf16.msra.mxu0 %v3399_v6  ;;  %v3406_v6 = vld [vmem:[%s4105_s6 + $0x88] sm:$0xff]  }
 0x465   : > { %1376 = vrot.lane.b32.xlu0 %v1357_v9, %s3536_s0 }
 0x467   : > { %1378 = vrot.lane.b32.xlu1 %v1360_v13, %s3536_s0 }
 0x468   : > { %v3232_v14 = vpop.f32.mrb[12].mxu0 }
 0x469   : > { %1564 = vrot.lane.b32.xlu0 %v1545_v8, %s3536_s0  ;;  %v1451_v15 = vpop.f32.mrb[13].mxu0 }
 0x46a   : > { %v3233_v16 = vpop.f32.mrb[14].mxu0 }
 0x46b   : > { %1566 = vrot.lane.b32.xlu1 %v1548_v12, %s3536_s0  ;;  %v1454_v17 = vpop.f32.mrb[15].mxu0 }
 0x46d   : > { %1474 = vrot.lane.b32.xlu0 %v3232_v14, %s3536_s0 }
 0x46f   : > { %1476 = vrot.lane.b32.xlu1 %v3233_v16, %s3536_s0 }
 0x471   : > { %1470 = vrot.lane.b32.xlu0 %v1451_v15, %s3536_s0 }
 0x473   : > { %1472 = vrot.lane.b32.xlu1 %v1454_v17, %s3536_s0 }
 0x475   : > { %1568 = vrot.lane.b32.xlu0 %v3240_v7, %s3536_s0  ;;  %v3400_v7 = vld [vmem:[%s4108_s9 + $0x18] sm:$0xff]  }
 0x476   : > { %3244 = vmatprep.subr.bf16.mxu0 %v3400_v7 }
 0x477   : > { %1570 = vrot.lane.b32.xlu1 %v3241_v11, %s3536_s0  ;;  %3245 = vmatpush3.bf16.msra.mxu0 %v3400_v7 }
 0x4d3   : > { %v1381_v22 = vpop.permute.xlu0 %1380 }
 0x4d4   : > { %v1390_v39 = vadd.f32 %v1381_v22, %v3764_v37 }
 0x4d5   : > { %v1383_v23 = vpop.permute.xlu1 %1382 }
 0x4d6   : > { %v1391_v47 = vadd.f32 %v1383_v23, %v3768_v40 }
 0x4d7   : > { %v1377_v24 = vpop.permute.xlu0 %1376 }
 0x4d8   : > { %v1388_v33 = vadd.f32 %v1377_v24, %v3766_v38 }
 0x4d9   : > { %v1379_v26 = vpop.permute.xlu1 %1378 }
 0x4da   : > { %v1389_v42 = vadd.f32 %v1379_v26, %v3771_v43 }
 0x4db   : > { %v1565_v27 = vpop.permute.xlu0 %1564 }
 0x4dd   : > { %v1567_v29 = vpop.permute.xlu1 %1566 }
 0x4df   : > { %v1475_v30 = vpop.permute.xlu0 %1474 }
 0x4e0   : > { %v1484_v50 = vadd.f32 %v1475_v30, %v1390_v39  ;;  %v3401_v39 = vld [vmem:[%s4105_s6 + $0x60] sm:$0xff]  }
 0x4e1   : > { %v1477_v32 = vpop.permute.xlu1 %1476  ;;  %3250 = vmatprep.subr.bf16.mxu1 %v3401_v39 }
 0x4e2   : > { %v1485_v54 = vadd.f32 %v1477_v32, %v1391_v47  ;;  %3251 = vmatpush3.bf16.msra.mxu1 %v3401_v39 }
 0x4e3   : > { %v1471_v35 = vpop.permute.xlu0 %1470 }
 0x4e4   : > { %v1482_v44 = vadd.f32 %v1471_v35, %v1388_v33 }
 0x4e5   : > { %v1473_v46 = vpop.permute.xlu1 %1472 }
 0x4e6   : > { %v1576_v52 = vadd.f32 %v1565_v27, %v1482_v44  ;;  %v1483_v0 = vadd.f32 %v1473_v46, %v1389_v42  ;;  %v3402_v42 = vld [vmem:[%s4105_s6 + $0x68] sm:$0xff]   ;;  %v3403_v44 = vld [vmem:[%s4105_s6 + $0x70] sm:$0xff]   ;;  %v2991_v46 = vld [vmem:[%s4109_s10 + $0x1] ss:$0 sm:$0xff] }
 0x4e7   : > { %v1569_v53 = vpop.permute.xlu0 %1568  ;;  %3252 = vmatprep.subr.bf16.mxu1 %v3402_v42 }
 0x4e8   : > { %v2982_v1 = vmul.f32 -1.442695, %v1576_v52  ;;  %v1577_v55 = vadd.f32 %v1567_v29, %v1483_v0  ;;  %v1578_v56 = vadd.f32 %v1569_v53, %v1484_v50  ;;  %3253 = vmatpush3.bf16.msra.mxu1 %v3402_v42 }
 0x4e9   : > { %v1571_v57 = vpop.permute.xlu1 %1570  ;;  %3258 = vmatprep.subr.bf16.mxu1 %v3403_v44 }
 0x4ea   : > { %3445 = vpow2.f32 %v2982_v1  ;;  %v2983_v38 = vmul.f32 -1.442695, %v1577_v55  ;;  %v2984_v58 = vmul.f32 -1.442695, %v1578_v56  ;;  %v1579_v60 = vadd.f32 %v1571_v57, %v1485_v54 }
 0x4ec   : > { %3447 = vpow2.f32 %v2983_v38  ;;  %v2985_v37 = vmul.f32 -1.442695, %v1579_v60 }
 0x4ed   : > { %3449 = vpow2.f32 %v2984_v58 }
 0x4ee   : > { %3451 = vpow2.f32 %v2985_v37 }
 0x4f4   : > { %v3446_v43 = vpop.eup %3445 }
 0x4f5   : > { %v1596_v61 = vadd.f32 1.0, %v3446_v43 }
 0x4f6   : > { %v3448_v40 = vpop.eup %3447 }
 0x4f7   : > { %3453 = vrcp.f32 %v1596_v61  ;;  %v1597_v63 = vadd.f32 1.0, %v3448_v40  ;;  %v3450_v2 = vpop.eup %3449 }
 0x4f8   : > { %v1598_v3 = vadd.f32 1.0, %v3450_v2  ;;  %v3452_v4 = vpop.eup %3451  ;;  %v3404_v2 = vld [vmem:[%s4105_s6 + $0x78] sm:$0xff]  }
 0x4f9   : > { %3455 = vrcp.f32 %v1597_v63  ;;  %v1599_v5 = vadd.f32 1.0, %v3452_v4  ;;  %v3405_v4 = vld [vmem:[%s4105_s6 + $0x80] sm:$0xff]  }
 0x4fa   : > { %3457 = vrcp.f32 %v1598_v3 }
 0x4fb   : > { %3459 = vrcp.f32 %v1599_v5 }
 0x4fc   : > { %3461 = vtanh.f32 %v1576_v52 }
 0x4fd   : > { %3463 = vtanh.f32 %v1577_v55 }
 0x4fe   : > { %3465 = vtanh.f32 %v1578_v56 }
 0x4ff   : > { %3467 = vtanh.f32 %v1579_v60 }
 0x501   : > { %v3454_v8 = vpop.eup %3453 }
 0x502   : > { %1612 = vrot.lane.b32.xlu0 %v3454_v8, %s3535_s26 }
 0x503   : > { %v3456_v9 = vpop.eup %3455 }
 0x504   : > { %1614 = vrot.lane.b32.xlu1 %v3456_v9, %s3535_s26  ;;  %v3458_v10 = vpop.eup %3457 }
 0x505   : > { %v3460_v11 = vpop.eup %3459 }
 0x506   : > { %1616 = vrot.lane.b32.xlu0 %v3458_v10, %s3535_s26  ;;  %v3462_v13 = vpop.eup %3461 }
 0x507   : > { %v3464_v14 = vpop.eup %3463 }
 0x508   : > { %1618 = vrot.lane.b32.xlu1 %v3460_v11, %s3535_s26  ;;  %v3466_v23 = vpop.eup %3465 }
 0x509   : > { %v3468_v26 = vpop.eup %3467 }
 0x574   : > { %v1613_v12 = vpop.permute.xlu0 %1612 }
 0x575   : > { %v1624_v16 = vmul.f32 %v3462_v13, %v1613_v12 }
 0x576   : > { %v1615_v15 = vpop.permute.xlu1 %1614 }
 0x577   : > { %v1625_v17 = vmul.f32 %v3464_v14, %v1615_v15 }
 0x578   : > { %v1617_v22 = vpop.permute.xlu0 %1616 }
 0x579   : > { %v1628_v24 = vpack.c.bf16 %v1625_v17, %v1624_v16  ;;  %v1626_v29 = vmul.f32 %v3466_v23, %v1617_v22 }
 0x57a   : > { %v1619_v27 = vpop.permute.xlu1 %1618 }
 0x57b   : > { %v1627_v30 = vmul.f32 %v3468_v26, %v1619_v27  ;;  %1645 = vrot.lane.b32.xlu0 %v1628_v24, %s3536_s0 }
 0x57d   : > { %v1629_v32 = vpack.c.bf16 %v1627_v30, %v1626_v29 }
 0x57f   : > { %1647 = vrot.lane.b32.xlu1 %v1629_v32, %s3536_s0  ;;  %v3407_v32 = vld [vmem:[%s4108_s9 + $0x20] sm:$0xff]  }
 0x580   : > { %3274 = vmatprep.subr.bf16.mxu0 %v3407_v32 }
 0x5ed   : > { %v1646_v33 = vpop.permute.xlu0 %1645 }
 0x5ee   : > { %3246 = vmatprep.mubr.msk.bf16.mxu0 %vm586_vm3, %v1646_v33 }
 0x5f1   : > { %v1648_v35 = vpop.permute.xlu1 %1647 }
 0x5f2   : > { %3247 = vmatmul.mubr.msk.bf16.vlgmr.msra.gmra.mrb[16].mxu0 %vm586_vm3, %v1648_v35 }
 0x5f3   : > { %3275 = vmatpush3.bf16.msra.mxu0 %v3407_v32 }
 0x6c5   : > { %v3248_v47 = vpop.f32.mrb[16].mxu0 }
 0x6c6   : > { %v3893_v50 = vadd.f32 %v3248_v47, %v2991_v46  ;;  %v1701_v52 = vpop.f32.mrb[17].mxu0 }
 0x6c7   : > { %v3895_v0 = vadd.f32 %v2991_v46, %v1701_v52  ;;  %v3249_v53 = vpop.f32.mrb[18].mxu0 }
 0x6c8   : > { %v1718_v54 = vadd.f32 %v3893_v50, %v3818_v49  ;;  %v3899_v1 = vadd.f32 %v3249_v53, %v2991_v46  ;;  %v1704_v55 = vpop.f32.mrb[19].mxu0 }
 0x6c9   : > { %v1716_v56 = vadd.f32 %v3895_v0, %v3822_v51  ;;  %v3903_v57 = vadd.f32 %v2991_v46, %v1704_v55  ;;  %v3408_v46 = vld [vmem:[%s4108_s9 + $0x28] sm:$0xff]  }
 0x6ca   : > { %v3905_v38 = vmul.f32 0.70710677, %v1718_v54  ;;  %v1719_v58 = vadd.f32 %v3899_v1, %v3828_v59  ;;  %3276 = vmatprep.subr.bf16.mxu0 %v3408_v46 }
 0x6cb   : > { %v3909_v60 = vmul.f32 0.70710677, %v1716_v56  ;;  %v1717_v37 = vadd.f32 %v3903_v57, %v3832_v62  ;;  %3277 = vmatpush3.bf16.msra.mxu0 %v3408_v46 }
 0x6cc   : > { %1730 = vst.msk [vmem:[#allocation3 + $0x18] sm:$0xff] %vm586_vm3, %v3905_v38  ;;  %v3915_v49 = vmul.f32 0.70710677, %v1719_v58 }
 0x6cd   : > { %1728 = vst.msk [vmem:[#allocation3 + $0x8] sm:$0xff] %vm586_vm3, %v3909_v60  ;;  %v3919_v51 = vmul.f32 0.70710677, %v1717_v37 }
 0x6ce   : > { %1731 = vst.msk [vmem:[#allocation3 + $0x20] sm:$0xff] %vm586_vm3, %v3915_v49  ;;  %v1816_v5 = vpack.c.bf16 %v3915_v49, %v3905_v38 }
 0x6cf   : > { %1729 = vst.msk [vmem:[#allocation3 + $0x10] sm:$0xff] %vm586_vm3, %v3919_v51  ;;  %v1815_v3 = vpack.c.bf16 %v3919_v51, %v3909_v60 }
 0x6d4   : > { %v1732_v43 = vld [vmem:[#allocation3 + $0x4] sm:$0xff] }
 0x6d5   : > { %v1735_v59 = vld [vmem:[#allocation3 + $0x1c] sm:$0xff]  ;;  %v1736_v8 = vld [vmem:[#allocation3 + $0x24] sm:$0xff] }
 0x6d6   : > { %v1733_v61 = vld [vmem:[#allocation3 + $0xc] sm:$0xff]  ;;  %v1734_v62 = vld [vmem:[#allocation3 + $0x14] sm:$0xff]  ;;  %v1894_v9 = vpack.c.bf16 %v1736_v8, %v1735_v59 }
 0x6d7   : > { %v1737_v40 = vpack.c.bf16 %v1733_v61, %v1732_v43  ;;  %v1738_v63 = vpack.c.bf16 %v1735_v59, %v1734_v62  ;;  %v1893_v7 = vpack.c.bf16 %v1734_v62, %v1733_v61  ;;  %v3411_v8 = vld [vmem:[%s4105_s6 + $0x98] sm:$0xff]  }
 0x6d9   : > { %3254 = vmatprep.mubr.msk.bf16.mxu1 %vm586_vm3, %v1737_v40 }
 0x6da   : > { %3255 = vmatmul.mubr.msk.bf16.vlgmr.msra.gmra.mrb[16].mxu1 %vm586_vm3, %v1738_v63 }
 0x6db   : > { %3259 = vmatpush3.bf16.msra.mxu1 %v3403_v44  ;;  %3262 = vmatprep.mubr.msk.bf16.mxu1 %vm586_vm3, %v1815_v3 }
 0x6dc   : > { %3260 = vmatprep.subr.bf16.mxu1 %v3404_v2 }
 0x6df   : > { %3261 = vmatpush3.bf16.msra.mxu1 %v3404_v2 }
 0x6e0   : > { %3266 = vmatprep.subr.bf16.mxu1 %v3405_v4 }
 0x6e6   : > { %3263 = vmatmul.mubr.msk.bf16.vlgmr.msra.gmra.mrb[16].mxu1 %vm586_vm3, %v1816_v5 }
 0x6e7   : > { %3267 = vmatpush3.bf16.msra.mxu1 %v3405_v4  ;;  %3270 = vmatprep.mubr.msk.bf16.mxu1 %vm586_vm3, %v1893_v7  ;;  %v3410_v7 = vld [vmem:[%s4105_s6 + $0xb0] sm:$0xff]  }
 0x6e8   : > { %3268 = vmatprep.subr.bf16.mxu1 %v3406_v6 }
 0x6eb   : > { %3269 = vmatpush3.bf16.msra.mxu1 %v3406_v6  ;;  %v3409_v6 = vld [vmem:[%s4105_s6 + $0x90] sm:$0xff]  }
 0x6ec   : > { %3282 = vmatprep.subr.bf16.mxu0 %v3409_v6  ;;  %3298 = vmatprep.subr.bf16.mxu1 %v3410_v7 }
 0x6f2   : > { %3271 = vmatmul.mubr.msk.bf16.vlgmr.msra.gmra.mrb[16].mxu1 %vm586_vm3, %v1894_v9  ;;  %v3412_v9 = vld [vmem:[%s4105_s6 + $0xb8] sm:$0xff]  }
 0x6f3   : > { %3299 = vmatpush3.bf16.msra.mxu1 %v3410_v7 }
 0x6f4   : > { %3300 = vmatprep.subr.bf16.mxu1 %v3412_v9 }
 0x6f7   : > { %3301 = vmatpush3.bf16.msra.mxu1 %v3412_v9 }
 0x7c5   : > { %v3272_v10 = vpop.f32.mrb[16].mxu1 }
 0x7c6   : > { %v3338_v11 = vadd.f32 %v3272_v10, %v3758_v31  ;;  %v1952_v12 = vpop.f32.mrb[17].mxu1  ;;  %v3413_v10 = vld [vmem:[%s4105_s6 + $0xa0] sm:$0xff]  }
 0x7c7   : > { %v3339_v13 = vadd.f32 %v1952_v12, %v3754_v25  ;;  %v3273_v14 = vpop.f32.mrb[18].mxu1 }
 0x7c8   : > { %v3022_v15 = vmul.f32 -1.442695, %v3338_v11  ;;  %v3340_v16 = vadd.f32 %v3273_v14, %v3760_v34  ;;  %v1955_v17 = vpop.f32.mrb[19].mxu1 }
 0x7c9   : > { %v3020_v22 = vmul.f32 -1.442695, %v3339_v13  ;;  %v3341_v23 = vadd.f32 %v1955_v17, %v3756_v28 }
 0x7ca   : > { %3469 = vpow2.f32 %v3022_v15  ;;  %v3023_v24 = vmul.f32 -1.442695, %v3340_v16 }
 0x7cb   : > { %3471 = vpow2.f32 %v3020_v22  ;;  %v3021_v26 = vmul.f32 -1.442695, %v3341_v23 }
 0x7cc   : > { %3473 = vpow2.f32 %v3023_v24 }
 0x7cd   : > { %3475 = vpow2.f32 %v3021_v26 }
 0x7d4   : > { %v3470_v27 = vpop.eup %3469 }
 0x7d5   : > { %v3472_v29 = vpop.eup %3471  ;;  %v1989_v33 = vadd.f32 1.0, %v3470_v27 }
 0x7d6   : > { %v1987_v30 = vadd.f32 1.0, %v3472_v29  ;;  %v3474_v35 = vpop.eup %3473 }
 0x7d7   : > { %v3476_v39 = vpop.eup %3475  ;;  %v1990_v44 = vadd.f32 1.0, %v3474_v35 }
 0x7d8   : > { %3477 = vrcp.f32 %v1987_v30  ;;  %v1988_v42 = vadd.f32 1.0, %v3476_v39  ;;  %v1725_v30 = vadd.f32 %v3903_v57, %v3816_v48 }
 0x7d9   : > { %3479 = vrcp.f32 %v1989_v33 }
 0x7da   : > { %3481 = vrcp.f32 %v1988_v42 }
 0x7db   : > { %3483 = vrcp.f32 %v1990_v44  ;;  %v2122_v44 = vld [vmem:[#allocation3 + $0x28] sm:$0xff] }
 0x7dc   : > { %3485 = vtanh.f32 %v3339_v13  ;;  %v1726_v13 = vadd.f32 %v3893_v50, %v3806_v36 }
 0x7dd   : > { %3487 = vtanh.f32 %v3341_v23  ;;  %v1727_v23 = vadd.f32 %v3899_v1, %v3812_v45 }
 0x7de   : > { %3489 = vtanh.f32 %v3338_v11  ;;  %v3029_v11 = vld [vmem:[%s4109_s10 + $0x2] ss:$0 sm:$0xff] }
 0x7df   : > { %3491 = vtanh.f32 %v3340_v16  ;;  %v1724_v16 = vadd.f32 %v3895_v0, %v3808_v41 }
 0x7e2   : > { %v3478_v47 = vpop.eup %3477 }
 0x7e3   : > { %2003 = vrot.lane.b32.xlu0 %v3478_v47, %s3535_s26  ;;  %v3480_v52 = vpop.eup %3479 }
 0x7e4   : > { %v3482_v53 = vpop.eup %3481 }
 0x7e5   : > { %2005 = vrot.lane.b32.xlu1 %v3482_v53, %s3535_s26  ;;  %v3484_v54 = vpop.eup %3483  ;;  %v3414_v53 = vld [vmem:[%s4105_s6 + $0xa8] sm:$0xff]  }
 0x7e6   : > { %v3486_v56 = vpop.eup %3485 }
 0x7e7   : > { %2007 = vrot.lane.b32.xlu0 %v3480_v52, %s3535_s26  ;;  %v3488_v58 = vpop.eup %3487 }
 0x7e8   : > { %v3490_v62 = vpop.eup %3489 }
 0x7e9   : > { %2009 = vrot.lane.b32.xlu1 %v3484_v54, %s3535_s26  ;;  %v3492_v63 = vpop.eup %3491 }
 0x855   : > { %v2004_v55 = vpop.permute.xlu0 %2003 }
 0x856   : > { %v2015_v59 = vmul.f32 %v3486_v56, %v2004_v55 }
 0x857   : > { %v2006_v37 = vpop.permute.xlu1 %2005 }
 0x858   : > { %v2016_v43 = vmul.f32 %v3488_v58, %v2006_v37 }
 0x859   : > { %v2008_v61 = vpop.permute.xlu0 %2007 }
 0x85a   : > { %v2019_v40 = vpack.c.bf16 %v2016_v43, %v2015_v59  ;;  %v2017_v3 = vmul.f32 %v3490_v62, %v2008_v61 }
 0x85b   : > { %v2010_v2 = vpop.permute.xlu1 %2009 }
 0x85c   : > { %v2018_v4 = vmul.f32 %v3492_v63, %v2010_v2  ;;  %3278 = vmatprep.mubr.msk.bf16.mxu0 %vm586_vm3, %v2019_v40 }
 0x85e   : > { %v2020_v5 = vpack.c.bf16 %v2018_v4, %v2017_v3 }
 0x860   : > { %3279 = vmatmul.mubr.msk.bf16.vlgmr.msra.gmra.mrb[20].mxu0 %vm586_vm3, %v2020_v5 }
 0x861   : > { %3283 = vmatpush3.bf16.msra.mxu0 %v3409_v6 }
 0x862   : > { %3284 = vmatprep.subr.bf16.mxu0 %v3411_v8 }
 0x865   : > { %3285 = vmatpush3.bf16.msra.mxu0 %v3411_v8 }
 0x866   : > { %3290 = vmatprep.subr.bf16.mxu0 %v3413_v10 }
 0x933   : > { %v3280_v12 = vpop.f32.mrb[20].mxu0 }
 0x934   : > { %v2095_v14 = vadd.f32 %v3280_v12, %v3029_v11  ;;  %v2086_v15 = vpop.f32.mrb[21].mxu0 }
 0x935   : > { %v2087_v17 = vadd.f32 %v3029_v11, %v2086_v15  ;;  %v3281_v22 = vpop.f32.mrb[22].mxu0 }
 0x936   : > { %v2103_v24 = vadd.f32 %v2095_v14, %v3905_v38  ;;  %v3985_v26 = vadd.f32 %v2095_v14, %v1726_v13  ;;  %v2098_v27 = vadd.f32 %v3281_v22, %v3029_v11  ;;  %v2089_v29 = vpop.f32.mrb[23].mxu0 }
 0x937   : > { %v2101_v36 = vadd.f32 %v2087_v17, %v3909_v60  ;;  %v3990_v50 = vadd.f32 %v2087_v17, %v1724_v16  ;;  %v2090_v32 = vadd.f32 %v3029_v11, %v2089_v29 }
 0x938   : > { %v2107_v41 = vmul.f32 0.70710677, %v2103_v24  ;;  %v2104_v0 = vadd.f32 %v2098_v27, %v3915_v49  ;;  %v3993_v33 = vadd.f32 %v2098_v27, %v1727_v23  ;;  %v2117_v49 = vld [vmem:[#allocation3] sm:$0xff] }
 0x939   : > { %v2105_v45 = vmul.f32 0.70710677, %v2101_v36  ;;  %v2102_v1 = vadd.f32 %v2090_v32, %v3919_v51  ;;  %v3996_v38 = vadd.f32 %v2090_v32, %v1725_v30 }
 0x93a   : > { %2115 = vst.msk [vmem:[#allocation3 + $0x18] sm:$0xff] %vm586_vm3, %v2107_v41  ;;  %v2108_v35 = vmul.f32 0.70710677, %v2104_v0 }
 0x93b   : > { %2113 = vst.msk [vmem:[#allocation3 + $0x8] sm:$0xff] %vm586_vm3, %v2105_v45  ;;  %v2106_v48 = vmul.f32 0.70710677, %v2102_v1 }
 0x93c   : > { %v2218_v57 = vpack.c.bf16 %v2108_v35, %v2107_v41  ;;  %2116 = vst.msk [vmem:[#allocation3 + $0x20] sm:$0xff] %vm586_vm3, %v2108_v35 }
 0x93d   : > { %v2217_v60 = vpack.c.bf16 %v2106_v48, %v2105_v45  ;;  %2114 = vst.msk [vmem:[#allocation3 + $0x10] sm:$0xff] %vm586_vm3, %v2106_v48 }
 0x941   : > { %v2120_v51 = vld [vmem:[#allocation3 + $0x18] sm:$0xff] }
 0x942   : > { %v2118_v39 = vld [vmem:[#allocation3 + $0x8] sm:$0xff] }
 0x943   : > { %v2123_v42 = vpack.c.bf16 %v2118_v39, %v2117_v49  ;;  %v2121_v47 = vld [vmem:[#allocation3 + $0x20] sm:$0xff] }
 0x944   : > { %v2119_v46 = vld [vmem:[#allocation3 + $0x10] sm:$0xff]  ;;  %v2311_v54 = vpack.c.bf16 %v2122_v44, %v2121_v47  ;;  %v3416_v44 = vld [vmem:[%s4108_s9 + $0x38] sm:$0xff]  }
 0x945   : > { %3286 = vmatprep.mubr.msk.bf16.mxu0 %vm586_vm3, %v2123_v42  ;;  %v2124_v52 = vpack.c.bf16 %v2120_v51, %v2119_v46  ;;  %v3415_v42 = vld [vmem:[%s4108_s9 + $0x30] sm:$0xff]  }
 0x947   : > { %3287 = vmatmul.mubr.msk.bf16.vlgmr.msra.gmra.mrb[24].mxu0 %vm586_vm3, %v2124_v52  ;;  %3302 = vmatprep.mubr.msk.bf16.mxu1 %vm586_vm3, %v2124_v52 }
 0x948   : > { %3291 = vmatpush3.bf16.msra.mxu0 %v3413_v10  ;;  %3294 = vmatprep.mubr.msk.bf16.mxu0 %vm586_vm3, %v2217_v60 }
 0x949   : > { %3303 = vmatmul.mubr.msk.bf16.vlgmr.msra.gmra.mrb[20].mxu1 %vm586_vm3, %v2311_v54  ;;  %3292 = vmatprep.subr.bf16.mxu0 %v3414_v53 }
 0x94c   : > { %3293 = vmatpush3.bf16.msra.mxu0 %v3414_v53 }
 0x94d   : > { %3306 = vmatprep.subr.bf16.mxu0 %v3415_v42 }
 0x94f   : > { %3295 = vmatmul.mubr.msk.bf16.vlgmr.msra.gmra.mrb[28].mxu0 %vm586_vm3, %v2218_v57 }
 0x950   : > { %3307 = vmatpush3.bf16.msra.mxu0 %v3415_v42 }
 0x951   : > { %3308 = vmatprep.subr.bf16.mxu0 %v3416_v44 }
 0x954   : > { %3309 = vmatpush3.bf16.msra.mxu0 %v3416_v44 }
 0xa1a   : > { %v3288_v55 = vpop.f32.mrb[24].mxu0 }
 0xa1b   : > { %2205 = vrot.lane.b32.xlu0 %v3288_v55, %s3536_s0  ;;  %v2182_v56 = vpop.f32.mrb[25].mxu0 }
 0xa1c   : > { %v3304_v58 = vpop.f32.mrb[20].mxu1  ;;  %v3289_v37 = vpop.f32.mrb[26].mxu0 }
 0xa1d   : > { %v2366_v59 = vpop.f32.mrb[21].mxu1  ;;  %2207 = vrot.lane.b32.xlu1 %v3289_v37, %s3536_s0  ;;  %v2185_v43 = vpop.f32.mrb[27].mxu0 }
 0xa1e   : > { %v3305_v61 = vpop.f32.mrb[22].mxu1 }
 0xa1f   : > { %v2369_v62 = vpop.f32.mrb[23].mxu1  ;;  %2201 = vrot.lane.b32.xlu0 %v2182_v56, %s3536_s0 }
 0xa21   : > { %2203 = vrot.lane.b32.xlu1 %v2185_v43, %s3536_s0 }
 0xa22   : > { %v3296_v40 = vpop.f32.mrb[28].mxu0 }
 0xa23   : > { %2385 = vrot.lane.b32.xlu0 %v2366_v59, %s3536_s0  ;;  %v2276_v63 = vpop.f32.mrb[29].mxu0 }
 0xa24   : > { %v3297_v2 = vpop.f32.mrb[30].mxu0 }
 0xa25   : > { %2387 = vrot.lane.b32.xlu1 %v2369_v62, %s3536_s0  ;;  %v2279_v3 = vpop.f32.mrb[31].mxu0 }
 0xa27   : > { %2299 = vrot.lane.b32.xlu0 %v3296_v40, %s3536_s0 }
 0xa29   : > { %2301 = vrot.lane.b32.xlu1 %v3297_v2, %s3536_s0 }
 0xa2b   : > { %2295 = vrot.lane.b32.xlu0 %v2276_v63, %s3536_s0 }
 0xa2d   : > { %2297 = vrot.lane.b32.xlu1 %v2279_v3, %s3536_s0 }
 0xa2f   : > { %2389 = vrot.lane.b32.xlu0 %v3304_v58, %s3536_s0 }
 0xa31   : > { %2391 = vrot.lane.b32.xlu1 %v3305_v61, %s3536_s0 }
 0xa8d   : > { %v2206_v4 = vpop.permute.xlu0 %2205 }
 0xa8e   : > { %v2215_v14 = vadd.f32 %v2206_v4, %v3758_v31 }
 0xa8f   : > { %v2208_v5 = vpop.permute.xlu1 %2207 }
 0xa90   : > { %v2216_v22 = vadd.f32 %v2208_v5, %v3760_v34 }
 0xa91   : > { %v2202_v6 = vpop.permute.xlu0 %2201 }
 0xa92   : > { %v2213_v12 = vadd.f32 %v2202_v6, %v3754_v25  ;;  %v3417_v6 = vld [vmem:[%s4110_s11] sm:$0xff]  }
 0xa93   : > { %v2204_v7 = vpop.permute.xlu1 %2203  ;;  %3314 = vmatprep.subr.bf16.mxu1 %v3417_v6 }
 0xa94   : > { %v2214_v15 = vadd.f32 %v2204_v7, %v3756_v28  ;;  %v3418_v7 = vld [vmem:[%s4110_s11 + $0x8] sm:$0xff]   ;;  %3315 = vmatpush3.bf16.msra.mxu1 %v3417_v6 }
 0xa95   : > { %v2386_v8 = vpop.permute.xlu0 %2385  ;;  %3316 = vmatprep.subr.bf16.mxu1 %v3418_v7 }
 0xa97   : > { %v2388_v9 = vpop.permute.xlu1 %2387 }
 0xa98   : > { %3317 = vmatpush3.bf16.msra.mxu1 %v3418_v7 }
 0xa99   : > { %v2300_v10 = vpop.permute.xlu0 %2299 }
 0xa9a   : > { %v2309_v23 = vadd.f32 %v2300_v10, %v2215_v14 }
 0xa9b   : > { %v2302_v11 = vpop.permute.xlu1 %2301 }
 0xa9c   : > { %v2310_v30 = vadd.f32 %v2302_v11, %v2216_v22 }
 0xa9d   : > { %v2296_v13 = vpop.permute.xlu0 %2295 }
 0xa9e   : > { %v2307_v16 = vadd.f32 %v2296_v13, %v2213_v12 }
 0xa9f   : > { %v2298_v17 = vpop.permute.xlu1 %2297 }
 0xaa0   : > { %v2397_v24 = vadd.f32 %v2386_v8, %v2307_v16  ;;  %v2308_v27 = vadd.f32 %v2298_v17, %v2214_v15  ;;  %v3067_v8 = vld [vmem:[%s4109_s10 + $0x3] ss:$0 sm:$0xff] }
 0xaa1   : > { %v2390_v29 = vpop.permute.xlu0 %2389 }
 0xaa2   : > { %v3058_v36 = vmul.f32 -1.442695, %v2397_v24  ;;  %v2398_v32 = vadd.f32 %v2388_v9, %v2308_v27  ;;  %v2399_v41 = vadd.f32 %v2390_v29, %v2309_v23 }
 0xaa3   : > { %v2392_v0 = vpop.permute.xlu1 %2391 }
 0xaa4   : > { %3493 = vpow2.f32 %v3058_v36  ;;  %v3059_v25 = vmul.f32 -1.442695, %v2398_v32  ;;  %v3060_v45 = vmul.f32 -1.442695, %v2399_v41  ;;  %v2400_v1 = vadd.f32 %v2392_v0, %v2310_v30 }
 0xaa6   : > { %3495 = vpow2.f32 %v3059_v25  ;;  %v3061_v31 = vmul.f32 -1.442695, %v2400_v1 }
 0xaa7   : > { %3497 = vpow2.f32 %v3060_v45 }
 0xaa8   : > { %3499 = vpow2.f32 %v3061_v31 }
 0xaae   : > { %v3494_v28 = vpop.eup %3493 }
 0xaaf   : > { %v2417_v35 = vadd.f32 1.0, %v3494_v28 }
 0xab0   : > { %v3496_v34 = vpop.eup %3495 }
 0xab1   : > { %3501 = vrcp.f32 %v2417_v35  ;;  %v2418_v48 = vadd.f32 1.0, %v3496_v34  ;;  %v3498_v57 = vpop.eup %3497 }
 0xab2   : > { %v2419_v60 = vadd.f32 1.0, %v3498_v57  ;;  %v3500_v49 = vpop.eup %3499 }
 0xab3   : > { %3503 = vrcp.f32 %v2418_v48  ;;  %v2420_v39 = vadd.f32 1.0, %v3500_v49 }
 0xab4   : > { %3505 = vrcp.f32 %v2419_v60 }
 0xab5   : > { %3507 = vrcp.f32 %v2420_v39 }
 0xab6   : > { %3509 = vtanh.f32 %v2397_v24 }
 0xab7   : > { %3511 = vtanh.f32 %v2398_v32 }
 0xab8   : > { %3513 = vtanh.f32 %v2399_v41 }
 0xab9   : > { %3515 = vtanh.f32 %v2400_v1 }
 0xabb   : > { %v3502_v46 = vpop.eup %3501 }
 0xabc   : > { %2433 = vrot.lane.b32.xlu0 %v3502_v46, %s3535_s26  ;;  %v3077_v46 = vld [vmem:[%s4113_s14] ss:$0 sm:$0xff] }
 0xabd   : > { %v3504_v51 = vpop.eup %3503 }
 0xabe   : > { %2435 = vrot.lane.b32.xlu1 %v3504_v51, %s3535_s26  ;;  %v3506_v47 = vpop.eup %3505 }
 0xabf   : > { %v3508_v52 = vpop.eup %3507 }
 0xac0   : > { %2437 = vrot.lane.b32.xlu0 %v3506_v47, %s3535_s26  ;;  %v3510_v54 = vpop.eup %3509 }
 0xac1   : > { %v3512_v55 = vpop.eup %3511 }
 0xac2   : > { %2439 = vrot.lane.b32.xlu1 %v3508_v52, %s3535_s26  ;;  %v3514_v43 = vpop.eup %3513 }
 0xac3   : > { %v3516_v62 = vpop.eup %3515 }
 0xb2e   : > { %v2434_v53 = vpop.permute.xlu0 %2433 }
 0xb2f   : > { %v2445_v58 = vmul.f32 %v3510_v54, %v2434_v53 }
 0xb30   : > { %v2436_v56 = vpop.permute.xlu1 %2435 }
 0xb31   : > { %v2446_v37 = vmul.f32 %v3512_v55, %v2436_v56 }
 0xb32   : > { %v2438_v59 = vpop.permute.xlu0 %2437 }
 0xb33   : > { %v2449_v61 = vpack.c.bf16 %v2446_v37, %v2445_v58  ;;  %v2447_v63 = vmul.f32 %v3514_v43, %v2438_v59 }
 0xb34   : > { %v2440_v40 = vpop.permute.xlu1 %2439 }
 0xb35   : > { %v2448_v2 = vmul.f32 %v3516_v62, %v2440_v40  ;;  %2466 = vrot.lane.b32.xlu0 %v2449_v61, %s3536_s0 }
 0xb37   : > { %v2450_v3 = vpack.c.bf16 %v2448_v2, %v2447_v63 }
 0xb39   : > { %2468 = vrot.lane.b32.xlu1 %v2450_v3, %s3536_s0 }
 0xba7   : > { %v2467_v4 = vpop.permute.xlu0 %2466 }
 0xba8   : > { %3310 = vmatprep.mubr.msk.bf16.mxu0 %vm586_vm3, %v2467_v4 }
 0xbab   : > { %v2469_v5 = vpop.permute.xlu1 %2468 }
 0xbac   : > { %3311 = vmatmul.mubr.msk.bf16.vlgmr.msra.gmra.mrb[32].mxu0 %vm586_vm3, %v2469_v5 }
 0xc7f   : > { %v3312_v9 = vpop.f32.mrb[32].mxu0 }
 0xc80   : > { %v2531_v10 = vadd.f32 %v3312_v9, %v3067_v8  ;;  %v2522_v11 = vpop.f32.mrb[33].mxu0 }
 0xc81   : > { %v2523_v12 = vadd.f32 %v3067_v8, %v2522_v11  ;;  %v3313_v13 = vpop.f32.mrb[34].mxu0 }
 0xc82   : > { %v2539_v14 = vadd.f32 %v2531_v10, %v3985_v26  ;;  %v2534_v15 = vadd.f32 %v3313_v13, %v3067_v8  ;;  %v2525_v16 = vpop.f32.mrb[35].mxu0 }
 0xc83   : > { %v2537_v17 = vadd.f32 %v2523_v12, %v3990_v50  ;;  %v2526_v22 = vadd.f32 %v3067_v8, %v2525_v16  ;;  %v3419_v50 = vld [vmem:[%s4112_s13] sm:$0xff]  }
 0xc84   : > { %v2540_v23 = vadd.f32 %v2534_v15, %v3993_v33  ;;  %v2543_v27 = vmax.f32 %v2539_v14, 0.0  ;;  %3322 = vmatprep.subr.bf16.mxu0 %v3419_v50  ;;  %v3420_v33 = vld [vmem:[%s4112_s13 + $0x8] sm:$0xff]  }
 0xc85   : > { %v2538_v24 = vadd.f32 %v2526_v22, %v3996_v38  ;;  %v2541_v30 = vmax.f32 %v2537_v17, 0.0  ;;  %3323 = vmatpush3.bf16.msra.mxu0 %v3419_v50  ;;  %v3072_v38 = vld [vmem:[%s4111_s12] ss:$0 sm:$0xff] }
 0xc86   : > { %v2544_v29 = vmax.f32 %v2540_v23, 0.0  ;;  %3324 = vmatprep.subr.bf16.mxu0 %v3420_v33 }
 0xc87   : > { %v2542_v36 = vmax.f32 %v2538_v24, 0.0 }
 0xc88   : > { %v2546_v32 = vpack.c.bf16 %v2544_v29, %v2543_v27 }
 0xc89   : > { %v2545_v41 = vpack.c.bf16 %v2542_v36, %v2541_v30  ;;  %3325 = vmatpush3.bf16.msra.mxu0 %v3420_v33 }
 0xc8a   : > { %2562 = vrot.lane.b32.xlu1 %v2546_v32, %s3535_s26 }
 0xc8b   : > { %2560 = vrot.lane.b32.xlu0 %v2545_v41, %s3535_s26 }
 0xcfc   : > { %v2563_v0 = vpop.permute.xlu1 %2562 }
 0xcfd   : > { %v2561_v26 = vpop.permute.xlu0 %2560 }
 0xcfe   : > { %3318 = vmatprep.mubr.msk.bf16.mxu1 %vm586_vm3, %v2561_v26 }
 0xcff   : > { %3319 = vmatmul.mubr.msk.bf16.vlgmr.msra.gmra.mrb[24].mxu1 %vm586_vm3, %v2563_v0 }
 0xdd2   : > { %v3320_v25 = vpop.f32.mrb[24].mxu1 }
 0xdd3   : > { %v2625_v45 = vadd.f32 %v3320_v25, %v3072_v38  ;;  %v2616_v1 = vpop.f32.mrb[25].mxu1 }
 0xdd4   : > { %v2617_v31 = vadd.f32 %v3072_v38, %v2616_v1  ;;  %v3321_v28 = vpop.f32.mrb[26].mxu1 }
 0xdd5   : > { %v2628_v35 = vadd.f32 %v3321_v28, %v3072_v38  ;;  %v2619_v34 = vpop.f32.mrb[27].mxu1  ;;  %v2633_v57 = vmax.f32 %v2625_v45, 0.0 }
 0xdd6   : > { %v2620_v48 = vadd.f32 %v3072_v38, %v2619_v34  ;;  %v2631_v49 = vmax.f32 %v2617_v31, 0.0 }
 0xdd7   : > { %v2634_v60 = vmax.f32 %v2628_v35, 0.0 }
 0xdd8   : > { %v2632_v39 = vmax.f32 %v2620_v48, 0.0 }
 0xdd9   : > { %v2636_v42 = vpack.c.bf16 %v2634_v60, %v2633_v57 }
 0xdda   : > { %v2635_v44 = vpack.c.bf16 %v2632_v39, %v2631_v49 }
 0xddc   : > { %3326 = vmatprep.mubr.msk.bf16.mxu0 %vm586_vm3, %v2635_v44 }
 0xddd   : > { %3327 = vmatmul.mubr.msk.bf16.vlgmr.msra.gmra.mrb[36].mxu0 %vm586_vm3, %v2636_v42 }
 0xeb0   : > { %v3328_v51 = vpop.f32.mrb[36].mxu0 }
 0xeb1   : > { %v2709_v47 = vadd.f32 %v3328_v51, %v3077_v46  ;;  %v2700_v52 = vpop.f32.mrb[37].mxu0 }
 0xeb2   : > { %v2701_v53 = vadd.f32 %v3077_v46, %v2700_v52  ;;  %v3329_v54 = vpop.f32.mrb[38].mxu0 }
 0xeb3   : > { %v2721_v55 = vsub.f32 0.0, %v2709_v47  ;;  %v2703_v56 = vpop.f32.mrb[39].mxu0  ;;  %v2712_v37 = vadd.f32 %v3329_v54, %v3077_v46  ;;  %v2717_v14 = vsub.f32 %v3666_v20, %v2709_v47 }
 0xeb4   : > { %v2719_v58 = vsub.f32 0.0, %v2701_v53  ;;  %v2704_v59 = vadd.f32 %v3077_v46, %v2703_v56  ;;  %v2715_v17 = vsub.f32 %v3662_v18, %v2701_v53 }
 0xeb5   : > { %v2727_v43 = vmul.f32 1.442695, %v2721_v55  ;;  %v2722_v63 = vsub.f32 0.0, %v2712_v37  ;;  %v2795_v4 = vsel %vm582_vm1, %v2721_v55, 0.0  ;;  %v2718_v27 = vsub.f32 %v3668_v21, %v2712_v37 }
 0xeb6   : > { %v2720_v61 = vsub.f32 0.0, %v2704_v59  ;;  %v2723_v62 = vmul.f32 1.442695, %v2719_v58  ;;  %v2792_v40 = vsel %vm582_vm1, %v2719_v58, 0.0  ;;  %v2716_v36 = vsub.f32 %v3664_v19, %v2704_v59 }
 0xeb7   : > { %3517 = vpow2.f32 %v2727_v43  ;;  %v2797_v7 = vsel %vm582_vm1, %v2722_v63, 0.0  ;;  %v2729_v9 = vmul.f32 1.442695, %v2722_v63 }
 0xeb8   : > { %v2793_v2 = vsel %vm582_vm1, %v2720_v61, 0.0  ;;  %3519 = vpow2.f32 %v2723_v62  ;;  %v2725_v5 = vmul.f32 1.442695, %v2720_v61 }
 0xeb9   : > { %v2794_v3 = vadd.f32 %v2793_v2, %v2792_v40 }
 0xeba   : > { %3521 = vpow2.f32 %v2725_v5 }
 0xebb   : > { %v2796_v6 = vadd.f32 %v2795_v4, %v2794_v3  ;;  %3523 = vpow2.f32 %v2729_v9 }
 0xebd   : > { %v2798_v8 = vadd.f32 %v2797_v7, %v2796_v6 }
 0xebf   : > { %2799 = vadd.xlane.f32.xlu0 %v2798_v8 }
 0xec1   : > { %v3518_v10 = vpop.eup %3517 }
 0xec2   : > { %2739 = vrot.lane.b32.xlu1 %v3518_v10, %s3537_s19  ;;  %v3520_v11 = vpop.eup %3519 }
 0xec4   : > { %v3522_v12 = vpop.eup %3521 }
 0xec5   : > { %v3524_v13 = vpop.eup %3523 }
 0xec6   : > { %2735 = vrot.lane.b32.xlu1 %v3520_v11, %s3537_s19 }
 0xeca   : > { %2737 = vrot.lane.b32.xlu1 %v3522_v12, %s3537_s19 }
 0xece   : > { %2741 = vrot.lane.b32.xlu1 %v3524_v13, %s3537_s19 }
 0xed2   : > { %2777 = vrot.lane.b32.xlu1 %v3664_v19, %s3537_s19 }
 0xed5   : > { %2775 = vrot.lane.b32.xlu0 %v3662_v18, %s3537_s19 }
 0xed6   : > { %2779 = vrot.lane.b32.xlu1 %v3666_v20, %s3537_s19 }
 0xf34   : > { %v2740_v15 = vpop.permute.xlu1 %2739 }
 0xf35   : > { %v2749_v16 = vmul.f32 %v2740_v15, %v2717_v14 }
 0xf37   : > { %2759 = vrot.lane.b32.xlu1 %v2749_v16, %s3538_s20 }
 0xf38   : > { %v2736_v22 = vpop.permute.xlu1 %2735 }
 0xf39   : > { %v2747_v23 = vmul.f32 %v2736_v22, %v2715_v17 }
 0xf3b   : > { %2755 = vrot.lane.b32.xlu1 %v2747_v23, %s3538_s20 }
 0xf3c   : > { %v2738_v24 = vpop.permute.xlu1 %2737 }
 0xf3d   : > { %v2748_v32 = vmul.f32 %v2738_v24, %v2716_v36 }
 0xf40   : > { %v2742_v29 = vpop.permute.xlu1 %2741 }
 0xf41   : > { %v2750_v30 = vmul.f32 %v2742_v29, %v2718_v27 }
 0xf43   : > { %2761 = vrot.lane.b32.xlu1 %v2750_v30, %s3538_s20 }
 0xf44   : > { %v2778_v38 = vpop.permute.xlu1 %2777 }
 0xf47   : > { %2757 = vrot.lane.b32.xlu1 %v2748_v32, %s3538_s20 }
 0xf48   : > { %v2780_v25 = vpop.permute.xlu1 %2779 }
 0xf4b   : > { %2781 = vrot.lane.b32.xlu1 %v3668_v21, %s3537_s19 }
 0xf4c   : > { %v2800_v20 = vpop.xlane.xlu0 %2799 }
 0xf4d   : > { %v2801_v41 = vrot.slane %v2800_v20, 4 }
 0xf4f   : > { %v2802_v18 = vadd.f32 %v2801_v41, %v2800_v20 }
 0xf50   : > { %v2776_v45 = vpop.permute.xlu0 %2775 }
 0xf51   : > { %v2803_v26 = vrot.slane %v2802_v18, 2 }
 0xf53   : > { %v2804_v0 = vadd.f32 %v2803_v26, %v2802_v18 }
 0xf55   : > { %v2805_v50 = vrot.slane %v2804_v0, 1 }
 0xf57   : > { %v2806_v33 = vadd.f32 %v2805_v50, %v2804_v0 }
 0xf59   : > { %3369 = vpush %v2806_v33 }
 0xf8a   : > { %s3370_s25 = spop %3369 }
 0xf8b   : > { %v2808_v19 = vstv %s3370_s25 }
 0xf8c   : > { %2810 = vst.msk [vmem:[%s550_s24] sm:$0x1] %vm2809_vm6, %v2808_v19 }
 0xfa9   : > { %v2760_v21 = vpop.permute.xlu1 %2759 }
 0xfaa   : > { %2769 = vst.msk [vmem:[%s547_s30 + $0x10] sm:$0xff] %vm582_vm1, %v2760_v21 }
 0xfab   : > { %2790 = vst.msk [vmem:[%s547_s30 + $0x10] sm:$0xff] %vm2787_vm7, %v2780_v25 }
 0xfad   : > { %v2756_v1 = vpop.permute.xlu1 %2755 }
 0xfae   : > { %2767 = vst.msk [vmem:[%s547_s30] sm:$0xff] %vm582_vm1, %v2756_v1 }
 0xfaf   : > { %2788 = vst.msk [vmem:[%s547_s30] sm:$0xff] %vm2787_vm7, %v2776_v45 }
 0xfb5   : > { %v2762_v31 = vpop.permute.xlu1 %2761 }
 0xfb6   : > { %2770 = vst.msk [vmem:[%s547_s30 + $0x18] sm:$0xff] %vm582_vm1, %v2762_v31 }
 0xfb9   : > { %v2758_v28 = vpop.permute.xlu1 %2757 }
 0xfba   : > { %2768 = vst.msk [vmem:[%s547_s30 + $0x8] sm:$0xff] %vm582_vm1, %v2758_v28 }
 0xfbb   : > { %2789 = vst.msk [vmem:[%s547_s30 + $0x8] sm:$0xff] %vm2787_vm7, %v2778_v38 }
 0xfbd   : > { %v2782_v35 = vpop.permute.xlu1 %2781 }
 0xfbe   : > { %2791 = vst.msk [vmem:[%s547_s30 + $0x18] sm:$0xff] %vm2787_vm7, %v2782_v35 }
 0xfbf PF: > { %s27_s21 = sadd.s32 1, %s3531_s21  }
 0xfc0   : > { %p24_p4 = scmp.ge.s32.totalorder %s27_s21, 4  }
 0xfc2   :  { %26 = sbr.rel (!%p24_p4) target bundleno = 2 (0x2), region = 144 }

</bundles_post_ra>
